<compile_context>
chip_gen: v7x
topology: tpu7x:2x2x1
jax: 0.10.0
libtpu: 0.0.40
codegen_flags: <defaults>
</compile_context>

<pallas_src>
import functools

import jax
import jax.numpy as jnp
from jax.experimental import pallas as pl
from jax.experimental.pallas import tpu as pltpu

NEG_SLOPE = 0.01          # PyTorch nn.LeakyReLU default negative_slope
HIDDEN_SIZE = 1024        # forced by Conv1d(128, 1024) in the no-BN branch
OUT_DIM = 10              # adj_option not in {'six-d','chordal','l2chordal','svd'}
OUT_PAD = 128             # lane-dense padded output width (sliced back to OUT_DIM)


def _leaky(x):
    # elementwise epilogue kept in f32 (v5e VPU has no bf16)
    return jnp.where(x > 0, x, NEG_SLOPE * x)


def _bf16(x):
    return x.astype(jnp.bfloat16)


def pointnet_kernel(x_ref,
                    w1a_ref, w1b_ref, b1_ref,
                    w2_ref, b2_ref,
                    w3_ref, b3_ref,
                    wm1_ref, bm1_ref,
                    wm2_ref, bm2_ref,
                    wm3_ref, bm3_ref,
                    out_ref):
    """One grid step == TB batch elements, full pipeline in VMEM."""
    TB, _, N, _ = x_ref.shape
    x = x_ref[...]                                        # (TB, 2, N, 3) f32

    # channel-concat of the two clouds == split first conv weight in halves
    p1 = _bf16(x[:, 0].reshape(TB * N, 3))                # (TB*N, 3)
    p2 = _bf16(x[:, 1].reshape(TB * N, 3))                # (TB*N, 3)

    # PointFeatCNN: Conv1d(6,64) -> LeakyReLU -> Conv1d(64,128) -> LeakyReLU
    #               -> Conv1d(128,1024) -> AdaptiveMaxPool1d(1)
    h = _leaky(jnp.dot(p1, w1a_ref[...], preferred_element_type=jnp.float32)
               + jnp.dot(p2, w1b_ref[...], preferred_element_type=jnp.float32)
               + b1_ref[...])                                               # (TB*N, 64)
    h = _leaky(jnp.dot(_bf16(h), w2_ref[...],
                       preferred_element_type=jnp.float32) + b2_ref[...])   # (TB*N, 128)
    h = jnp.dot(_bf16(h), w3_ref[...],
                preferred_element_type=jnp.float32) + b3_ref[...]           # (TB*N, 1024)

    # AdaptiveMaxPool1d(1): max over the point axis, per batch element
    feat = jnp.max(h.reshape(TB, N, HIDDEN_SIZE), axis=1)                   # (TB, 1024)

    # hidden_mlp: Linear(1024,256) -> LeakyReLU -> Linear(256,128) -> LeakyReLU
    #             -> Linear(128, out_dim)   (run at M=TB, not M=1)
    m = _leaky(jnp.dot(_bf16(feat), wm1_ref[...],
                       preferred_element_type=jnp.float32) + bm1_ref[...])  # (TB, 256)
    m = _leaky(jnp.dot(_bf16(m), wm2_ref[...],
                       preferred_element_type=jnp.float32) + bm2_ref[...])  # (TB, 128)
    out = jnp.dot(_bf16(m), wm3_ref[...],
                  preferred_element_type=jnp.float32) + bm3_ref[...]        # (TB, OUT_PAD)

    out_ref[...] = out.astype(out_ref.dtype)


def _choose_tb(B, N):
    """Batch-per-step: fill the MXU M dim but keep the (rows,1024) slab small."""
    target_rows = 512     # ~2-4x the 128/256 MXU row height
    max_rows = 2048       # (rows, 1024) f32 conv3 intermediate <= 8 MiB (v7x VMEM)
    n = max(N, 1)
    return max(1, min(target_rows // n, max_rows // n, B))


@jax.jit
def pointnet_forward(x, params):
    """x: (B, 2, N, 3) float32 -> (B, OUT_DIM) float32."""
    B, two, N, three = x.shape
    assert two == 2 and three == 3

    TB = _choose_tb(B, N)
    Bp = ((B + TB - 1) // TB) * TB
    if Bp != B:
        # pad batch; padded rows never mix with real ones and are sliced off
        x = jnp.pad(x, ((0, Bp - B), (0, 0), (0, 0), (0, 0)))

    weight_names = ("w1a", "w1b", "b1", "w2", "b2", "w3", "b3",
                    "wm1", "bm1", "wm2", "bm2", "wm3", "bm3")
    weights = [params[k] for k in weight_names]

    in_specs = [pl.BlockSpec((TB, 2, N, 3), lambda b: (b, 0, 0, 0))]
    # All weights/biases are 2-D and resident (constant index map).
    # NOTE: pipeline_mode=pl.Buffered(1) would halve their VMEM footprint but is
    # skipped here to keep lowering maximally portable across jax versions.
    in_specs += [pl.BlockSpec(w.shape, lambda b: (0, 0)) for w in weights]

    conv_flops = 2 * Bp * N * (2 * 3 * 64 + 64 * 128 + 128 * HIDDEN_SIZE)
    mlp_flops = 2 * Bp * (HIDDEN_SIZE * 256 + 256 * 128 + 128 * OUT_PAD)
    bytes_accessed = (x.size * x.dtype.itemsize
                      + sum(w.size * w.dtype.itemsize for w in weights)
                      + Bp * OUT_PAD * 4)

    out = pl.pallas_call(
        pointnet_kernel,
        out_shape=jax.ShapeDtypeStruct((Bp, OUT_PAD), jnp.float32),
        grid_spec=pltpu.PrefetchScalarGridSpec(
            num_scalar_prefetch=0,
            grid=(Bp // TB,),
            in_specs=in_specs,
            out_specs=pl.BlockSpec((TB, OUT_PAD), lambda b: (b, 0)),
        ),
        compiler_params=pltpu.CompilerParams(
            dimension_semantics=("parallel",),
            vmem_limit_bytes=48 * 1024 * 1024,
        ),
        cost_estimate=pl.CostEstimate(
            flops=int(conv_flops + mlp_flops),
            transcendentals=0,
            bytes_accessed=int(bytes_accessed),
        ),
    )(x, *weights)

    return out[:B, :OUT_DIM]


def init_params(key):
    """Deterministic synthetic parameters.

    Conv1d (k=1) / Linear weights stored as (C_in, C_out); matmul weights in
    bf16 (f32 accumulation in-kernel), biases in f32.  The first conv weight
    is split into the two 3-channel halves (cloud 1 / cloud 2); the last
    Linear is zero-padded from OUT_DIM to OUT_PAD output lanes.
    """
    ks = jax.random.split(key, 12)

    def w(k, cin, cout):
        return jax.random.normal(k, (cin, cout), jnp.float32) / jnp.sqrt(cin)

    def b(k, cout):
        return jax.random.normal(k, (1, cout), jnp.float32) * 0.02

    bf = lambda a: a.astype(jnp.bfloat16)
    w1 = w(ks[0], 6, 64)
    wm3 = jnp.pad(w(ks[10], 128, OUT_DIM), ((0, 0), (0, OUT_PAD - OUT_DIM)))
    bm3 = jnp.pad(b(ks[11], OUT_DIM), ((0, 0), (0, OUT_PAD - OUT_DIM)))

    return {
        # PointFeatCNN (no batch-norm branch)
        "w1a": bf(w1[:3]), "w1b": bf(w1[3:]), "b1": b(ks[1], 64),
        "w2": bf(w(ks[2], 64, 128)), "b2": b(ks[3], 128),
        "w3": bf(w(ks[4], 128, HIDDEN_SIZE)), "b3": b(ks[5], HIDDEN_SIZE),
        # hidden_mlp
        "wm1": bf(w(ks[6], HIDDEN_SIZE, 256)), "bm1": b(ks[7], 256),
        "wm2": bf(w(ks[8], 256, 128)), "bm2": b(ks[9], 128),
        "wm3": bf(wm3), "bm3": bm3,
    }


def pointnet_ref(x, p):
    """Pure-JAX reference mirroring the kernel math (bf16 matmuls, f32 acc)."""
    B, _, N, _ = x.shape

    def mm(a, w):
        return jnp.dot(a.astype(jnp.bfloat16), w,
                       preferred_element_type=jnp.float32)

    p1 = x[:, 0].reshape(B * N, 3)
    p2 = x[:, 1].reshape(B * N, 3)
    h = _leaky(mm(p1, p["w1a"]) + mm(p2, p["w1b"]) + p["b1"])
    h = _leaky(mm(h, p["w2"]) + p["b2"])
    h = mm(h, p["w3"]) + p["b3"]
    feat = jnp.max(h.reshape(B, N, HIDDEN_SIZE), axis=1)
    m = _leaky(mm(feat, p["wm1"]) + p["bm1"])
    m = _leaky(mm(m, p["wm2"]) + p["bm2"])
    out = mm(m, p["wm3"]) + p["bm3"]
    return out[:, :OUT_DIM]


if __name__ == "__main__":
    key = jax.random.PRNGKey(0)
    k_x, k_p = jax.random.split(key)

    B, N = 2, 16  # batch=2, num_points=16, two point clouds of 3-D points each
    x = jax.random.normal(k_x, (B, 2, N, 3), jnp.float32)
    params = init_params(k_p)

    out = jax.block_until_ready(pointnet_forward(x, params))
    ref = pointnet_ref(x, params)

    assert out.shape == (B, OUT_DIM)
    assert jnp.allclose(out, ref, rtol=1e-2, atol=1e-2), "mismatch vs reference"

    print("KERNEL_OK")
</pallas_src>

<mosaic_0001>
module attributes {stable_mosaic.version = 11 : i64} {
  func.func @pointnet_kernel(%arg0: i32, %arg1: memref<2x2x16x3xf32, #tpu.memory_space<vmem>>, %arg2: memref<3x64xbf16, #tpu.memory_space<vmem>>, %arg3: memref<3x64xbf16, #tpu.memory_space<vmem>>, %arg4: memref<1x64xf32, #tpu.memory_space<vmem>>, %arg5: memref<64x128xbf16, #tpu.memory_space<vmem>>, %arg6: memref<1x128xf32, #tpu.memory_space<vmem>>, %arg7: memref<128x1024xbf16, #tpu.memory_space<vmem>>, %arg8: memref<1x1024xf32, #tpu.memory_space<vmem>>, %arg9: memref<1024x256xbf16, #tpu.memory_space<vmem>>, %arg10: memref<1x256xf32, #tpu.memory_space<vmem>>, %arg11: memref<256x128xbf16, #tpu.memory_space<vmem>>, %arg12: memref<1x128xf32, #tpu.memory_space<vmem>>, %arg13: memref<128x128xbf16, #tpu.memory_space<vmem>>, %arg14: memref<1x128xf32, #tpu.memory_space<vmem>>, %arg15: memref<2x128xf32, #tpu.memory_space<vmem>>) attributes {dimension_semantics = [#tpu.dimension_semantics<parallel>], iteration_bounds = array<i64: 1>, scalar_prefetch = 0 : i64, scratch_operands = 0 : i64, tpu.core_type = #tpu.core_type<tc>, window_params = [{transform_indices = @transform_0, window_bounds = array<i64: 2, 2, 16, 3>}, {pipeline_mode = #tpu.pipeline_mode<synchronous>, transform_indices = @transform_1, window_bounds = array<i64: 3, 64>}, {pipeline_mode = #tpu.pipeline_mode<synchronous>, transform_indices = @transform_2, window_bounds = array<i64: 3, 64>}, {pipeline_mode = #tpu.pipeline_mode<synchronous>, transform_indices = @transform_3, window_bounds = array<i64: 1, 64>}, {pipeline_mode = #tpu.pipeline_mode<synchronous>, transform_indices = @transform_4, window_bounds = array<i64: 64, 128>}, {pipeline_mode = #tpu.pipeline_mode<synchronous>, transform_indices = @transform_5, window_bounds = array<i64: 1, 128>}, {pipeline_mode = #tpu.pipeline_mode<synchronous>, transform_indices = @transform_6, window_bounds = array<i64: 128, 1024>}, {pipeline_mode = #tpu.pipeline_mode<synchronous>, transform_indices = @transform_7, window_bounds = array<i64: 1, 1024>}, {pipeline_mode = #tpu.pipeline_mode<synchronous>, transform_indices = @transform_8, window_bounds = array<i64: 1024, 256>}, {pipeline_mode = #tpu.pipeline_mode<synchronous>, transform_indices = @transform_9, window_bounds = array<i64: 1, 256>}, {pipeline_mode = #tpu.pipeline_mode<synchronous>, transform_indices = @transform_10, window_bounds = array<i64: 256, 128>}, {pipeline_mode = #tpu.pipeline_mode<synchronous>, transform_indices = @transform_11, window_bounds = array<i64: 1, 128>}, {pipeline_mode = #tpu.pipeline_mode<synchronous>, transform_indices = @transform_12, window_bounds = array<i64: 128, 128>}, {pipeline_mode = #tpu.pipeline_mode<synchronous>, transform_indices = @transform_13, window_bounds = array<i64: 1, 128>}, {transform_indices = @transform_14, window_bounds = array<i64: 2, 128>}]} {
    %c0 = arith.constant 0 : index
    %c0_0 = arith.constant 0 : index
    %c0_1 = arith.constant 0 : index
    %c0_2 = arith.constant 0 : index
    %0 = vector.load %arg1[%c0, %c0_0, %c0_1, %c0_2] : memref<2x2x16x3xf32, #tpu.memory_space<vmem>>, vector<2x2x16x3xf32>
    %1 = vector.extract_strided_slice %0 {offsets = [0, 0, 0, 0], sizes = [2, 1, 16, 3], strides = [1, 1, 1, 1]} : vector<2x2x16x3xf32> to vector<2x1x16x3xf32>
    %2 = vector.shape_cast %1 : vector<2x1x16x3xf32> to vector<2x16x3xf32>
    %3 = vector.shape_cast %2 : vector<2x16x3xf32> to vector<32x3xf32>
    %4 = arith.truncf %3 : vector<32x3xf32> to vector<32x3xbf16>
    %5 = vector.extract_strided_slice %0 {offsets = [0, 1, 0, 0], sizes = [2, 1, 16, 3], strides = [1, 1, 1, 1]} : vector<2x2x16x3xf32> to vector<2x1x16x3xf32>
    %6 = vector.shape_cast %5 : vector<2x1x16x3xf32> to vector<2x16x3xf32>
    %7 = vector.shape_cast %6 : vector<2x16x3xf32> to vector<32x3xf32>
    %8 = arith.truncf %7 : vector<32x3xf32> to vector<32x3xbf16>
    %c0_3 = arith.constant 0 : index
    %c0_4 = arith.constant 0 : index
    %9 = vector.load %arg2[%c0_3, %c0_4] : memref<3x64xbf16, #tpu.memory_space<vmem>>, vector<3x64xbf16>
    %cst = arith.constant dense<0.000000e+00> : vector<32x64xf32>
    %10 = tpu.matmul %4, %9, %cst {dimension_numbers = #tpu.dot_dimension_numbers<[1], [0], [0], [1], [0, 0, 1, 1], [], []>} : vector<32x3xbf16>, vector<3x64xbf16>, vector<32x64xf32> -> vector<32x64xf32>
    %c0_5 = arith.constant 0 : index
    %c0_6 = arith.constant 0 : index
    %11 = vector.load %arg3[%c0_5, %c0_6] : memref<3x64xbf16, #tpu.memory_space<vmem>>, vector<3x64xbf16>
    %cst_7 = arith.constant dense<0.000000e+00> : vector<32x64xf32>
    %12 = tpu.matmul %8, %11, %cst_7 {dimension_numbers = #tpu.dot_dimension_numbers<[1], [0], [0], [1], [0, 0, 1, 1], [], []>} : vector<32x3xbf16>, vector<3x64xbf16>, vector<32x64xf32> -> vector<32x64xf32>
    %13 = arith.addf %10, %12 : vector<32x64xf32>
    %c0_8 = arith.constant 0 : index
    %c0_9 = arith.constant 0 : index
    %14 = vector.load %arg4[%c0_8, %c0_9] : memref<1x64xf32, #tpu.memory_space<vmem>>, vector<1x64xf32>
    %15 = vector.broadcast %14 : vector<1x64xf32> to vector<32x64xf32>
    %16 = arith.addf %13, %15 : vector<32x64xf32>
    %cst_10 = arith.constant 0.000000e+00 : f32
    %17 = vector.broadcast %cst_10 : f32 to vector<32x64xf32>
    %18 = arith.cmpf ogt, %16, %17 : vector<32x64xf32>
    %cst_11 = arith.constant 0.00999999977 : f32
    %19 = vector.broadcast %cst_11 : f32 to vector<32x64xf32>
    %20 = arith.mulf %19, %16 : vector<32x64xf32>
    %21 = arith.select %18, %16, %20 : vector<32x64xi1>, vector<32x64xf32>
    %22 = arith.truncf %21 : vector<32x64xf32> to vector<32x64xbf16>
    %c0_12 = arith.constant 0 : index
    %c0_13 = arith.constant 0 : index
    %23 = vector.load %arg5[%c0_12, %c0_13] : memref<64x128xbf16, #tpu.memory_space<vmem>>, vector<64x128xbf16>
    %cst_14 = arith.constant dense<0.000000e+00> : vector<32x128xf32>
    %24 = tpu.matmul %22, %23, %cst_14 {dimension_numbers = #tpu.dot_dimension_numbers<[1], [0], [0], [1], [0, 0, 1, 1], [], []>} : vector<32x64xbf16>, vector<64x128xbf16>, vector<32x128xf32> -> vector<32x128xf32>
    %c0_15 = arith.constant 0 : index
    %c0_16 = arith.constant 0 : index
    %25 = vector.load %arg6[%c0_15, %c0_16] : memref<1x128xf32, #tpu.memory_space<vmem>>, vector<1x128xf32>
    %26 = vector.broadcast %25 : vector<1x128xf32> to vector<32x128xf32>
    %27 = arith.addf %24, %26 : vector<32x128xf32>
    %cst_17 = arith.constant 0.000000e+00 : f32
    %28 = vector.broadcast %cst_17 : f32 to vector<32x128xf32>
    %29 = arith.cmpf ogt, %27, %28 : vector<32x128xf32>
    %cst_18 = arith.constant 0.00999999977 : f32
    %30 = vector.broadcast %cst_18 : f32 to vector<32x128xf32>
    %31 = arith.mulf %30, %27 : vector<32x128xf32>
    %32 = arith.select %29, %27, %31 : vector<32x128xi1>, vector<32x128xf32>
    %33 = arith.truncf %32 : vector<32x128xf32> to vector<32x128xbf16>
    %c0_19 = arith.constant 0 : index
    %c0_20 = arith.constant 0 : index
    %34 = vector.load %arg7[%c0_19, %c0_20] : memref<128x1024xbf16, #tpu.memory_space<vmem>>, vector<128x1024xbf16>
    %cst_21 = arith.constant dense<0.000000e+00> : vector<32x1024xf32>
    %35 = tpu.matmul %33, %34, %cst_21 {dimension_numbers = #tpu.dot_dimension_numbers<[1], [0], [0], [1], [0, 0, 1, 1], [], []>} : vector<32x128xbf16>, vector<128x1024xbf16>, vector<32x1024xf32> -> vector<32x1024xf32>
    %c0_22 = arith.constant 0 : index
    %c0_23 = arith.constant 0 : index
    %36 = vector.load %arg8[%c0_22, %c0_23] : memref<1x1024xf32, #tpu.memory_space<vmem>>, vector<1x1024xf32>
    %37 = vector.broadcast %36 : vector<1x1024xf32> to vector<32x1024xf32>
    %38 = arith.addf %35, %37 : vector<32x1024xf32>
    %39 = vector.shape_cast %38 : vector<32x1024xf32> to vector<2x16x1024xf32>
    %cst_24 = arith.constant dense<0xFF800000> : vector<2x1024xf32>
    %40 = vector.multi_reduction <maximumf>, %39, %cst_24 [1] : vector<2x16x1024xf32> to vector<2x1024xf32>
    %41 = arith.truncf %40 : vector<2x1024xf32> to vector<2x1024xbf16>
    %c0_25 = arith.constant 0 : index
    %c0_26 = arith.constant 0 : index
    %42 = vector.load %arg9[%c0_25, %c0_26] : memref<1024x256xbf16, #tpu.memory_space<vmem>>, vector<1024x256xbf16>
    %cst_27 = arith.constant dense<0.000000e+00> : vector<2x256xf32>
    %43 = tpu.matmul %41, %42, %cst_27 {dimension_numbers = #tpu.dot_dimension_numbers<[1], [0], [0], [1], [0, 0, 1, 1], [], []>} : vector<2x1024xbf16>, vector<1024x256xbf16>, vector<2x256xf32> -> vector<2x256xf32>
    %c0_28 = arith.constant 0 : index
    %c0_29 = arith.constant 0 : index
    %44 = vector.load %arg10[%c0_28, %c0_29] : memref<1x256xf32, #tpu.memory_space<vmem>>, vector<1x256xf32>
    %45 = vector.broadcast %44 : vector<1x256xf32> to vector<2x256xf32>
    %46 = arith.addf %43, %45 : vector<2x256xf32>
    %cst_30 = arith.constant 0.000000e+00 : f32
    %47 = vector.broadcast %cst_30 : f32 to vector<2x256xf32>
    %48 = arith.cmpf ogt, %46, %47 : vector<2x256xf32>
    %cst_31 = arith.constant 0.00999999977 : f32
    %49 = vector.broadcast %cst_31 : f32 to vector<2x256xf32>
    %50 = arith.mulf %49, %46 : vector<2x256xf32>
    %51 = arith.select %48, %46, %50 : vector<2x256xi1>, vector<2x256xf32>
    %52 = arith.truncf %51 : vector<2x256xf32> to vector<2x256xbf16>
    %c0_32 = arith.constant 0 : index
    %c0_33 = arith.constant 0 : index
    %53 = vector.load %arg11[%c0_32, %c0_33] : memref<256x128xbf16, #tpu.memory_space<vmem>>, vector<256x128xbf16>
    %cst_34 = arith.constant dense<0.000000e+00> : vector<2x128xf32>
    %54 = tpu.matmul %52, %53, %cst_34 {dimension_numbers = #tpu.dot_dimension_numbers<[1], [0], [0], [1], [0, 0, 1, 1], [], []>} : vector<2x256xbf16>, vector<256x128xbf16>, vector<2x128xf32> -> vector<2x128xf32>
    %c0_35 = arith.constant 0 : index
    %c0_36 = arith.constant 0 : index
    %55 = vector.load %arg12[%c0_35, %c0_36] : memref<1x128xf32, #tpu.memory_space<vmem>>, vector<1x128xf32>
    %56 = vector.broadcast %55 : vector<1x128xf32> to vector<2x128xf32>
    %57 = arith.addf %54, %56 : vector<2x128xf32>
    %cst_37 = arith.constant 0.000000e+00 : f32
    %58 = vector.broadcast %cst_37 : f32 to vector<2x128xf32>
    %59 = arith.cmpf ogt, %57, %58 : vector<2x128xf32>
    %cst_38 = arith.constant 0.00999999977 : f32
    %60 = vector.broadcast %cst_38 : f32 to vector<2x128xf32>
    %61 = arith.mulf %60, %57 : vector<2x128xf32>
    %62 = arith.select %59, %57, %61 : vector<2x128xi1>, vector<2x128xf32>
    %63 = arith.truncf %62 : vector<2x128xf32> to vector<2x128xbf16>
    %c0_39 = arith.constant 0 : index
    %c0_40 = arith.constant 0 : index
    %64 = vector.load %arg13[%c0_39, %c0_40] : memref<128x128xbf16, #tpu.memory_space<vmem>>, vector<128x128xbf16>
    %cst_41 = arith.constant dense<0.000000e+00> : vector<2x128xf32>
    %65 = tpu.matmul %63, %64, %cst_41 {dimension_numbers = #tpu.dot_dimension_numbers<[1], [0], [0], [1], [0, 0, 1, 1], [], []>} : vector<2x128xbf16>, vector<128x128xbf16>, vector<2x128xf32> -> vector<2x128xf32>
    %c0_42 = arith.constant 0 : index
    %c0_43 = arith.constant 0 : index
    %66 = vector.load %arg14[%c0_42, %c0_43] : memref<1x128xf32, #tpu.memory_space<vmem>>, vector<1x128xf32>
    %67 = vector.broadcast %66 : vector<1x128xf32> to vector<2x128xf32>
    %68 = arith.addf %65, %67 : vector<2x128xf32>
    %c0_44 = arith.constant 0 : index
    %c0_45 = arith.constant 0 : index
    %69 = vector.load %arg15[%c0_44, %c0_45] : memref<2x128xf32, #tpu.memory_space<vmem>>, vector<2x128xf32>
    tpu.vector_store %arg15[%c0_44, %c0_45], %68 {strides = array<i32>} : memref<2x128xf32, #tpu.memory_space<vmem>>, vector<2x128xf32>,
    return
  }
  func.func @transform_0(%arg0: i32) -> (i32, i32, i32, i32) {
    %c0_i32 = arith.constant 0 : i32
    %c0_i32_0 = arith.constant 0 : i32
    %c0_i32_1 = arith.constant 0 : i32
    %c0_i32_2 = arith.constant 0 : i32
    return %arg0, %c0_i32, %c0_i32_0, %c0_i32_1 : i32, i32, i32, i32
  }
  func.func @transform_1(%arg0: i32) -> (i32, i32) {
    %c0_i32 = arith.constant 0 : i32
    %c0_i32_0 = arith.constant 0 : i32
    %c0_i32_1 = arith.constant 0 : i32
    return %c0_i32, %c0_i32_0 : i32, i32
  }
  func.func @transform_2(%arg0: i32) -> (i32, i32) {
    %c0_i32 = arith.constant 0 : i32
    %c0_i32_0 = arith.constant 0 : i32
    %c0_i32_1 = arith.constant 0 : i32
    return %c0_i32, %c0_i32_0 : i32, i32
  }
  func.func @transform_3(%arg0: i32) -> (i32, i32) {
    %c0_i32 = arith.constant 0 : i32
    %c0_i32_0 = arith.constant 0 : i32
    %c0_i32_1 = arith.constant 0 : i32
    return %c0_i32, %c0_i32_0 : i32, i32
  }
  func.func @transform_4(%arg0: i32) -> (i32, i32) {
    %c0_i32 = arith.constant 0 : i32
    %c0_i32_0 = arith.constant 0 : i32
    %c0_i32_1 = arith.constant 0 : i32
    return %c0_i32, %c0_i32_0 : i32, i32
  }
  func.func @transform_5(%arg0: i32) -> (i32, i32) {
    %c0_i32 = arith.constant 0 : i32
    %c0_i32_0 = arith.constant 0 : i32
    %c0_i32_1 = arith.constant 0 : i32
    return %c0_i32, %c0_i32_0 : i32, i32
  }
  func.func @transform_6(%arg0: i32) -> (i32, i32) {
    %c0_i32 = arith.constant 0 : i32
    %c0_i32_0 = arith.constant 0 : i32
    %c0_i32_1 = arith.constant 0 : i32
    return %c0_i32, %c0_i32_0 : i32, i32
  }
  func.func @transform_7(%arg0: i32) -> (i32, i32) {
    %c0_i32 = arith.constant 0 : i32
    %c0_i32_0 = arith.constant 0 : i32
    %c0_i32_1 = arith.constant 0 : i32
    return %c0_i32, %c0_i32_0 : i32, i32
  }
  func.func @transform_8(%arg0: i32) -> (i32, i32) {
    %c0_i32 = arith.constant 0 : i32
    %c0_i32_0 = arith.constant 0 : i32
    %c0_i32_1 = arith.constant 0 : i32
    return %c0_i32, %c0_i32_0 : i32, i32
  }
  func.func @transform_9(%arg0: i32) -> (i32, i32) {
    %c0_i32 = arith.constant 0 : i32
    %c0_i32_0 = arith.constant 0 : i32
    %c0_i32_1 = arith.constant 0 : i32
    return %c0_i32, %c0_i32_0 : i32, i32
  }
  func.func @transform_10(%arg0: i32) -> (i32, i32) {
    %c0_i32 = arith.constant 0 : i32
    %c0_i32_0 = arith.constant 0 : i32
    %c0_i32_1 = arith.constant 0 : i32
    return %c0_i32, %c0_i32_0 : i32, i32
  }
  func.func @transform_11(%arg0: i32) -> (i32, i32) {
    %c0_i32 = arith.constant 0 : i32
    %c0_i32_0 = arith.constant 0 : i32
    %c0_i32_1 = arith.constant 0 : i32
    return %c0_i32, %c0_i32_0 : i32, i32
  }
  func.func @transform_12(%arg0: i32) -> (i32, i32) {
    %c0_i32 = arith.constant 0 : i32
    %c0_i32_0 = arith.constant 0 : i32
    %c0_i32_1 = arith.constant 0 : i32
    return %c0_i32, %c0_i32_0 : i32, i32
  }
  func.func @transform_13(%arg0: i32) -> (i32, i32) {
    %c0_i32 = arith.constant 0 : i32
    %c0_i32_0 = arith.constant 0 : i32
    %c0_i32_1 = arith.constant 0 : i32
    return %c0_i32, %c0_i32_0 : i32, i32
  }
  func.func @transform_14(%arg0: i32) -> (i32, i32) {
    %c0_i32 = arith.constant 0 : i32
    %c0_i32_0 = arith.constant 0 : i32
    return %arg0, %c0_i32 : i32, i32
  }
}

</mosaic_0001>

<bundles_post_ra>
// kernel: pointnet_forward.1
= control target key start
LH: loop header
LB: loop body
LE: loop exit
PB: predicated region body
PF: predicated region fallthrough
CT: control target
= control target key end

     0   :  { %19 = vsyncpa [#allocation3], 0  ;;  %s3406_s0 = inlined_call_operand.vmem [shape: f32[2,2,16,3], index: 0, kind: input, shape index: {}]   ;;  %s3407_s1 = inlined_call_operand.vmem [shape: bf16[3,64], index: 1, kind: input, shape index: {}]   ;;  %s3408_s2 = inlined_call_operand.vmem [shape: bf16[3,64], index: 2, kind: input, shape index: {}]   ;;  %s3409_s3 = inlined_call_operand.vmem [shape: f32[1,64], index: 3, kind: input, shape index: {}]   ;;  %s3410_s4 = inlined_call_operand.vmem [shape: bf16[64,128], index: 4, kind: input, shape index: {}]   ;;  %s3411_s5 = inlined_call_operand.vmem [shape: f32[1,128], index: 5, kind: input, shape index: {}]   ;;  %s3412_s6 = inlined_call_operand.hbm [shape: bf16[128,1024], index: 6, kind: input, shape index: {}]   ;;  %s3413_s7 = inlined_call_operand.vmem [shape: f32[1,1024], index: 7, kind: input, shape index: {}]   ;;  %s3414_s8 = inlined_call_operand.hbm [shape: bf16[1024,256], index: 8, kind: input, shape index: {}]   ;;  %s3415_s9 = inlined_call_operand.vmem [shape: f32[1,256], index: 9, kind: input, shape index: {}]   ;;  %s3416_s10 = inlined_call_operand.hbm [shape: bf16[256,128], index: 10, kind: input, shape index: {}]   ;;  %s3417_s11 = inlined_call_operand.vmem [shape: f32[1,128], index: 11, kind: input, shape index: {}]   ;;  %s3418_s12 = inlined_call_operand.vmem [shape: bf16[128,128], index: 12, kind: input, shape index: {}]   ;;  %s3419_s13 = inlined_call_operand.vmem [shape: f32[1,128], index: 13, kind: input, shape index: {}]   ;;  %s3420_s14 = inlined_call_operand.hbm [shape: f32[2,128], index: 14, kind: output, shape index: {}]  }
   0x1   :  { %20 = vsyncpa [#allocation6], 0 }
   0x2   :  { %21 = vsyncpa [#allocation4], 0  ;;  %s3102_s29 = smov [#allocation5]   ;;  %s3008_s17 = scalar_lea.hbm %s3414_s8, 16384 }
   0x3   :  { %s53_s30 = sshll.u32 %s3102_s29, 4  ;;  %p3009_p0 = scmp.ne.s32.totalorder %s3414_s8, %s3008_s17  ;;  %s54_s30 = int_to_ptr.vmem [resolvable:$true] %s53_s30 }
   0x4   :  { %p3012_p1 = scmp.lt.u32.totalorder %s3008_s17, %s3414_s8 }
   0x6   :  { %p3014_p2 = pnand %p3012_p1, %p3009_p0 }
   0x8   :  { %3017 = shalt.err (!%p3014_p2)
}
   0x9   :  { %s3018_s22 = scalar_lea.vmem %s54_s30, 16384  ;;  %p3023_p4 = scmp.lt.s32.totalorder %s54_s30, %s54_s30 }
   0xa   :  { %p3019_p3 = scmp.ne.s32.totalorder %s54_s30, %s3018_s22  ;;  %p3024_p5 = scmp.lt.s32.totalorder %s3018_s22, %s3018_s22 }
   0xc   :  { %p3025_p6 = por %p3024_p5, %p3023_p4 }
   0xe   :  { %p3026_p7 = pnand %p3025_p6, %p3019_p3 }
  0x10   :  { %3029 = shalt.err (!%p3026_p7)
}
  0x11   :  { %s3103_s23 = smov 128   ;;  %s3104_s24 = smov 8  }
  0x12   :  { %59 = dma.hbm_to_vmem [thread:$0]  %s3414_s8, 16384, %s54_s30, [#allocation6], %s3103_s23, %s3103_s23, %s3104_s24  }
  0x13   :  { %s3105_s27 = smov [#allocation2]   ;;  %s3030_s16 = scalar_lea.hbm %s3412_s6, 8192 }
  0x14   :  { %s39_s28 = sshll.u32 %s3105_s27, 4  ;;  %p3031_p8 = scmp.ne.s32.totalorder %s3412_s6, %s3030_s16  ;;  %s40_s28 = int_to_ptr.vmem [resolvable:$true] %s39_s28 }
  0x15   :  { %p3034_p9 = scmp.lt.u32.totalorder %s3030_s16, %s3412_s6 }
  0x17   :  { %p3036_p10 = pnand %p3034_p9, %p3031_p8 }
  0x19   :  { %3039 = shalt.err (!%p3036_p10)
}
  0x1a   :  { %s3040_s21 = scalar_lea.vmem %s40_s28, 8192  ;;  %p3045_p12 = scmp.lt.s32.totalorder %s40_s28, %s40_s28 }
  0x1b   :  { %p3041_p11 = scmp.ne.s32.totalorder %s40_s28, %s3040_s21  ;;  %p3046_p13 = scmp.lt.s32.totalorder %s3040_s21, %s3040_s21 }
  0x1d   :  { %p3047_p0 = por %p3046_p13, %p3045_p12 }
  0x1f   :  { %p3048_p1 = pnand %p3047_p0, %p3041_p11 }
  0x21   :  { %3051 = shalt.err (!%p3048_p1)
}
  0x22   :  { %s3106_s8 = smov 512   ;;  %s3107_s30 = smov 32  }
  0x23   :  { %45 = dma.hbm_to_vmem [thread:$0]  %s3412_s6, 8192, %s40_s28, [#allocation3], %s3106_s8, %s3106_s8, %s3107_s30  }
  0x24   :  { %s3108_s24 = smov [#allocation7]   ;;  %s3052_s29 = scalar_lea.hbm %s3416_s10, 2048 }
  0x25   :  { %s67_s25 = sshll.u32 %s3108_s24, 4  ;;  %p3053_p2 = scmp.ne.s32.totalorder %s3416_s10, %s3052_s29  ;;  %s68_s25 = int_to_ptr.vmem [resolvable:$true] %s67_s25 }
  0x26   :  { %p3056_p3 = scmp.lt.u32.totalorder %s3052_s29, %s3416_s10 }
  0x28   :  { %p3058_p4 = pnand %p3056_p3, %p3053_p2 }
  0x2a   :  { %3061 = shalt.err (!%p3058_p4)
}
  0x2b   :  { %s3062_s19 = scalar_lea.vmem %s68_s25, 2048  ;;  %p3067_p6 = scmp.lt.s32.totalorder %s68_s25, %s68_s25 }
  0x2c   :  { %p3063_p5 = scmp.ne.s32.totalorder %s68_s25, %s3062_s19  ;;  %p3068_p7 = scmp.lt.s32.totalorder %s3062_s19, %s3062_s19 }
  0x2e   :  { %p3069_p8 = por %p3068_p7, %p3067_p6 }
  0x30   :  { %p3070_p9 = pnand %p3069_p8, %p3063_p5 }
  0x32   :  { %3073 = shalt.err (!%p3070_p9)
}
  0x33   :  { %s3109_s6 = smov 64   ;;  %s3110_s28 = smov 4  }
  0x34   :  { %73 = dma.hbm_to_vmem [thread:$0]  %s3416_s10, 2048, %s68_s25, [#allocation6], %s3109_s6, %s3109_s6, %s3110_s28  }
  0x35   :  { %3096 = dma.done.wait [#allocation3], 8192  }
  0x36   :  { %3097 = vsyncadd [#allocation3], 4294959104 }
  0x37   :  { %3098 = dma.done.wait [#allocation6], 18432  }
  0x38   :  { %3099 = vsyncadd [#allocation6], 4294948864  ;;  %vm111_vm0 = vcmask 1040384   ;;  %vm112_vm1 = vcmask 1041408   ;;  %v3111_v0 = vmov 65535   ;;  %v92_v5 = vld [vmem:[%s3406_s0 + $0x10] sm:$0xff] }
  0x39   :  { %v113_v1 = vsel %vm111_vm0, 4294967295, %v3111_v0  ;;  %v102_v3 = vld [vmem:[%s3407_s1] sm:$0x3]  ;;  %v93_v8 = vld [vmem:[%s3406_s0 + $0x18] sm:$0xff]  ;;  %vm104_vm2 = vcmask 23552   ;;  %v96_v9 = vld [vmem:[%s3406_s0 + $0x30] sm:$0xff] }
  0x3a   :  { %v114_v2 = vsel %vm112_vm1, %v113_v1, 0  ;;  %v103_v4 = vld [vmem:[%s3408_s2] sm:$0x3]  ;;  %v97_v10 = vld [vmem:[%s3406_s0 + $0x38] sm:$0xff]  ;;  %v100_v11 = vpack.c.bf16 %v93_v8, %v92_v5  ;;  %v91_v13 = vld [vmem:[%s3406_s0 + $0x8] sm:$0xff]  ;;  %vm289_vm7 = vcmask 523264  }
  0x3b   :  { %v116_v6 = vand.u32 %v114_v2, %v103_v4  ;;  %v174_v7 = vand.u32 %v114_v2, %v102_v3  ;;  %v90_v12 = vld [vmem:[%s3406_s0] sm:$0xff]  ;;  %v101_v14 = vpack.c.bf16 %v97_v10, %v96_v9  ;;  %v95_v18 = vld [vmem:[%s3406_s0 + $0x28] sm:$0xff]  ;;  %v2790_v21 = vld [vmem:[%s3410_s4 + $0x10] sm:$0xff]   ;;  %vm1297_vm12 = vcmask 1041409  }
  0x3c   :  { %2716 = vmatprep.mubr.msk.bf16.mxu0 %vm104_vm2, %v100_v11  ;;  %v98_v15 = vpack.c.bf16 %v91_v13, %v90_v12  ;;  %v2788_v16 = vld [vmem:[%s3410_s4] sm:$0xff]   ;;  %v2789_v20 = vld [vmem:[%s3410_s4 + $0x8] sm:$0xff]   ;;  %v2791_v22 = vld [vmem:[%s3410_s4 + $0x18] sm:$0xff]   ;;  %vm3114_vm15 = vmmov 0  }
  0x3d   :  { %2714 = vmatprep.subr.bf16.mxu0 %v116_v6  ;;  %2726 = vmatprep.subr.bf16.mxu1 %v2788_v16  ;;  %v94_v17 = vld [vmem:[%s3406_s0 + $0x20] sm:$0xff]  ;;  %v361_v27 = vld [vmem:[#allocation2 + $0x10] sm:$0xff]  ;;  %s3115_s0 = smov [#allocation8]  }
  0x3e   :  { %2715 = vmatpush3.bf16.msra.mxu0 %v116_v6  ;;  %2727 = vmatpush3.bf16.msra.mxu1 %v2788_v16  ;;  %v99_v19 = vpack.c.bf16 %v95_v18, %v94_v17  ;;  %v3273_v23 = vld [vmem:[#allocation2] sm:$0xff]  ;;  %v365_v28 = vld [vmem:[#allocation2 + $0x30] sm:$0xff]  ;;  %s2431_s4 = sshll.u32 %s3115_s0, 4  ;;  %s2432_s4 = int_to_ptr.vmem [resolvable:$true] %s2431_s4 }
  0x3f   :  { %2720 = vmatprep.subr.bf16.mxu0 %v174_v7  ;;  %2728 = vmatprep.subr.bf16.mxu1 %v2789_v20  ;;  %v3275_v24 = vld [vmem:[#allocation2 + $0x20] sm:$0xff]  ;;  %v2457_v29 = vcombine.low %v361_v27, %v365_v28  ;;  %v2458_v30 = vcombine.high %v361_v27, %v365_v28  ;;  %v369_v31 = vld [vmem:[#allocation2 + $0x50] sm:$0xff]  ;;  %p3079_p11 = scmp.lt.s32.totalorder %s2432_s4, %s2432_s4 }
  0x40   :  { %v2453_v25 = vcombine.low %v3273_v23, %v3275_v24  ;;  %v2454_v26 = vcombine.high %v3273_v23, %v3275_v24  ;;  %v373_v32 = vld [vmem:[#allocation2 + $0x70] sm:$0xff]  ;;  %v2445_v51 = vld [vmem:[%s3409_s3] ss:$0 sm:$0xff] }
  0x41   :  { %2717 = vmatmul.mubr.msk.bf16.vlgmr.msra.gmra.mrb[0].mxu0 %vm104_vm2, %v101_v14  ;;  %v2465_v33 = vcombine.low %v369_v31, %v373_v32  ;;  %v2466_v34 = vcombine.high %v369_v31, %v373_v32  ;;  %v377_v35 = vld [vmem:[#allocation2 + $0x90] sm:$0xff]  ;;  %v367_v2 = vld [vmem:[#allocation2 + $0x40] sm:$0xff] }
  0x42   :  { %2721 = vmatpush3.bf16.msra.mxu0 %v174_v7  ;;  %2722 = vmatprep.mubr.msk.bf16.mxu0 %vm104_vm2, %v98_v15  ;;  %v381_v36 = vld [vmem:[#allocation2 + $0xb0] sm:$0xff]  ;;  %v371_v3 = vld [vmem:[#allocation2 + $0x60] sm:$0xff] }
  0x43   :  { %2729 = vmatpush3.bf16.msra.mxu1 %v2789_v20  ;;  %891 = vmatprep.subr.bf16.mxu0 %v2458_v30  ;;  %v2473_v37 = vcombine.low %v377_v35, %v381_v36  ;;  %v2474_v38 = vcombine.high %v377_v35, %v381_v36  ;;  %v385_v39 = vld [vmem:[#allocation2 + $0xd0] sm:$0xff]  ;;  %v2462_v8 = vcombine.high %v367_v2, %v371_v3  ;;  %v375_v9 = vld [vmem:[#allocation2 + $0x80] sm:$0xff] }
  0x44   :  { %2730 = vmatprep.subr.bf16.mxu1 %v2790_v21  ;;  %v389_v40 = vld [vmem:[#allocation2 + $0xf0] sm:$0xff]  ;;  %v379_v10 = vld [vmem:[#allocation2 + $0xa0] sm:$0xff]  ;;  %v2461_v11 = vcombine.low %v367_v2, %v371_v3 }
  0x45   :  { %v2481_v41 = vcombine.low %v385_v39, %v389_v40  ;;  %v2482_v42 = vcombine.high %v385_v39, %v389_v40  ;;  %v393_v43 = vld [vmem:[#allocation2 + $0x110] sm:$0xff]  ;;  %v2470_v12 = vcombine.high %v375_v9, %v379_v10  ;;  %v383_v13 = vld [vmem:[#allocation2 + $0xc0] sm:$0xff]  ;;  %v2469_v15 = vcombine.low %v375_v9, %v379_v10  ;;  %v384_v9 = vld [vmem:[#allocation2 + $0xc8] sm:$0xff] }
  0x46   :  { %v397_v44 = vld [vmem:[#allocation2 + $0x130] sm:$0xff]  ;;  %v387_v14 = vld [vmem:[#allocation2 + $0xe0] sm:$0xff]  ;;  %v388_v10 = vld [vmem:[#allocation2 + $0xe8] sm:$0xff] }
  0x47   :  { %2731 = vmatpush3.bf16.msra.mxu1 %v2790_v21  ;;  %v2489_v45 = vcombine.low %v393_v43, %v397_v44  ;;  %v2490_v46 = vcombine.high %v393_v43, %v397_v44  ;;  %v401_v47 = vld [vmem:[#allocation2 + $0x150] sm:$0xff]  ;;  %v2478_v16 = vcombine.high %v383_v13, %v387_v14  ;;  %v391_v17 = vld [vmem:[#allocation2 + $0x100] sm:$0xff]  ;;  %v364_v43 = vld [vmem:[#allocation2 + $0x28] sm:$0xff] }
  0x48   :  { %2732 = vmatprep.subr.bf16.mxu1 %v2791_v22  ;;  %v405_v48 = vld [vmem:[#allocation2 + $0x170] sm:$0xff]  ;;  %v395_v18 = vld [vmem:[#allocation2 + $0x120] sm:$0xff] }
  0x49   :  { %v2497_v49 = vcombine.low %v401_v47, %v405_v48  ;;  %v2498_v50 = vcombine.high %v401_v47, %v405_v48  ;;  %v2486_v20 = vcombine.high %v391_v17, %v395_v18  ;;  %v399_v21 = vld [vmem:[#allocation2 + $0x140] sm:$0xff]  ;;  %v2485_v23 = vcombine.low %v391_v17, %v395_v18  ;;  %v413_v30 = vld [vmem:[#allocation2 + $0x1b0] sm:$0xff]  ;;  %v400_v17 = vld [vmem:[#allocation2 + $0x148] sm:$0xff] }
  0x4a   :  { %v411_v27 = vld [vmem:[#allocation2 + $0x1a0] sm:$0xff]  ;;  %v404_v18 = vld [vmem:[#allocation2 + $0x168] sm:$0xff] }
  0x4b   :  { %2733 = vmatpush3.bf16.msra.mxu1 %v2791_v22  ;;  %v403_v22 = vld [vmem:[#allocation2 + $0x160] sm:$0xff] }
  0x4c   :  { %785 = vmatprep.subr.bf16.mxu1 %v2454_v26  ;;  %v2494_v24 = vcombine.high %v399_v21, %v403_v22  ;;  %v407_v26 = vld [vmem:[#allocation2 + $0x180] sm:$0xff] }
  0x4d   :  { %2723 = vmatmul.mubr.msk.bf16.vlgmr.msra.gmra.mrb[0].mxu0 %vm104_vm2, %v99_v19  ;;  %v2477_v19 = vcombine.low %v383_v13, %v387_v14  ;;  %v2502_v28 = vcombine.high %v407_v26, %v411_v27  ;;  %v2501_v31 = vcombine.low %v407_v26, %v411_v27  ;;  %v419_v35 = vld [vmem:[#allocation2 + $0x1e0] sm:$0xff]  ;;  %v392_v13 = vld [vmem:[#allocation2 + $0x108] sm:$0xff] }
  0x4e   :  { %892 = vmatpush1.bf16.msra.mxu0 %v2457_v29  ;;  %v409_v29 = vld [vmem:[#allocation2 + $0x190] sm:$0xff]  ;;  %v2446_v47 = vld [vmem:[%s3411_s5] ss:$0 sm:$0xff]  ;;  %v396_v14 = vld [vmem:[#allocation2 + $0x128] sm:$0xff] }
  0x4f   :  { %893 = vmatprep.subr.bf16.mxu0 %v2466_v34  ;;  %v2506_v32 = vcombine.high %v409_v29, %v413_v30  ;;  %v415_v34 = vld [vmem:[#allocation2 + $0x1c0] sm:$0xff]  ;;  %v420_v26 = vld [vmem:[#allocation2 + $0x1e8] sm:$0xff] }
  0x50   :  { %v2510_v36 = vcombine.high %v415_v34, %v419_v35  ;;  %v2509_v39 = vcombine.low %v415_v34, %v419_v35  ;;  %v374_v34 = vld [vmem:[#allocation2 + $0x78] sm:$0xff] }
  0x52   :  { %894 = vmatpush1.bf16.msra.mxu0 %v2465_v33  ;;  %v2505_v33 = vcombine.low %v409_v29, %v413_v30  ;;  %v362_v29 = vld [vmem:[#allocation2 + $0x18] sm:$0xff] }
  0x53   :  { %895 = vmatprep.subr.bf16.mxu0 %v2474_v38  ;;  %v421_v38 = vld [vmem:[#allocation2 + $0x1f0] sm:$0xff]  ;;  %v366_v30 = vld [vmem:[#allocation2 + $0x38] sm:$0xff] }
  0x54   :  { %v2459_v35 = vcombine.low %v362_v29, %v366_v30 }
  0x56   :  { %896 = vmatpush1.bf16.msra.mxu0 %v2473_v37  ;;  %v417_v37 = vld [vmem:[#allocation2 + $0x1d0] sm:$0xff] }
  0x57   :  { %897 = vmatprep.subr.bf16.mxu0 %v2482_v42  ;;  %v2514_v40 = vcombine.high %v417_v37, %v421_v38  ;;  %v360_v42 = vld [vmem:[#allocation2 + $0x8] sm:$0xff] }
  0x58   :  { %v2456_v44 = vcombine.high %v360_v42, %v364_v43 }
  0x5a   :  { %898 = vmatpush1.bf16.msra.mxu0 %v2481_v41  ;;  %v2513_v41 = vcombine.low %v417_v37, %v421_v38  ;;  %v378_v37 = vld [vmem:[#allocation2 + $0x98] sm:$0xff] }
  0x5b   :  { %899 = vmatprep.subr.bf16.mxu0 %v2490_v46  ;;  %v3112_v46 = vmov 0   ;;  %v382_v38 = vld [vmem:[#allocation2 + $0xb8] sm:$0xff] }
  0x5c   :  { %923 = vmatprep.mubr.bf16.mxu0 %v3112_v46 }
  0x5e   :  { %900 = vmatpush1.bf16.msra.mxu0 %v2489_v45  ;;  %v2455_v45 = vcombine.low %v360_v42, %v364_v43  ;;  %v390_v42 = vld [vmem:[#allocation2 + $0xf8] sm:$0xff]  ;;  %v2475_v43 = vcombine.low %v378_v37, %v382_v38 }
  0x5f   :  { %901 = vmatprep.subr.bf16.mxu0 %v2498_v50 }
  0x62   :  { %902 = vmatpush1.bf16.msra.mxu0 %v2497_v49 }
  0x63   :  { %903 = vmatprep.subr.bf16.mxu0 %v2506_v32  ;;  %v2460_v32 = vcombine.high %v362_v29, %v366_v30  ;;  %v2840_v29 = vld [vmem:[#allocation5 + $0x140] ss:$8 sps:$4 sm:$0xff]   ;;  %v2839_v30 = vld [vmem:[#allocation5 + $0xb4] ss:$8 sps:$4 sm:$0xff]  }
  0x66   :  { %904 = vmatpush1.bf16.msra.mxu0 %v2505_v33  ;;  %v370_v33 = vld [vmem:[#allocation2 + $0x58] sm:$0xff] }
  0x67   :  { %905 = vmatprep.subr.bf16.mxu0 %v2514_v40  ;;  %v2476_v40 = vcombine.high %v378_v37, %v382_v38  ;;  %v2852_v37 = vld [vmem:[#allocation5 + $0x160] ss:$8 sps:$4 sm:$0xff]   ;;  %v2851_v38 = vld [vmem:[#allocation5 + $0xd4] ss:$8 sps:$4 sm:$0xff]  }
  0x6a   :  { %906 = vmatpush1.bf16.msra.mxu0 %v2513_v41  ;;  %v386_v41 = vld [vmem:[#allocation2 + $0xd8] sm:$0xff] }
 0x120   :  { %v2724_v52 = vpop.f32.mrb[0].mxu0 }
 0x121   :  { %v234_v53 = vadd.f32 %v2724_v52, %v2445_v51  ;;  %v210_v54 = vpop.f32.mrb[1].mxu0 }
 0x122   :  { %v232_v55 = vadd.f32 %v2445_v51, %v210_v54  ;;  %v2725_v56 = vpop.f32.mrb[2].mxu0 }
 0x123   :  { %v242_v57 = vmul.f32 0.01, %v234_v53  ;;  %v235_v58 = vadd.f32 %v2725_v56, %v2445_v51  ;;  %v213_v59 = vpop.f32.mrb[3].mxu0  ;;  %vm238_vm3 = vcmp.gt.f32.partialorder %v234_v53, 0.0 }
 0x124   :  { %v240_v60 = vmul.f32 0.01, %v232_v55  ;;  %v233_v61 = vadd.f32 %v2445_v51, %v213_v59  ;;  %vm236_vm5 = vcmp.gt.f32.partialorder %v232_v55, 0.0 }
 0x125   :  { %vm239_vm4 = vcmp.gt.f32.partialorder %v235_v58, 0.0  ;;  %v243_v62 = vmul.f32 0.01, %v235_v58  ;;  %v246_v0 = vsel %vm238_vm3, %v234_v53, %v242_v57 }
 0x126   :  { %v241_v63 = vmul.f32 0.01, %v233_v61  ;;  %vm237_vm6 = vcmp.gt.f32.partialorder %v233_v61, 0.0  ;;  %v244_v5 = vsel %vm236_vm5, %v232_v55, %v240_v60  ;;  %v368_v60 = vld [vmem:[#allocation2 + $0x48] sm:$0xff] }
 0x127   :  { %v247_v1 = vsel %vm239_vm4, %v235_v58, %v243_v62 }
 0x128   :  { %v249_v4 = vpack.c.bf16 %v247_v1, %v246_v0  ;;  %v245_v6 = vsel %vm237_vm6, %v233_v61, %v241_v63  ;;  %v372_v61 = vld [vmem:[#allocation2 + $0x68] sm:$0xff] }
 0x129   :  { %v248_v7 = vpack.c.bf16 %v245_v6, %v244_v5  ;;  %v376_v5 = vld [vmem:[#allocation2 + $0x88] sm:$0xff] }
 0x12a   :  { %v380_v6 = vld [vmem:[#allocation2 + $0xa8] sm:$0xff] }
 0x12b   :  { %2734 = vmatprep.mubr.msk.bf16.mxu1 %vm289_vm7, %v248_v7  ;;  %v2463_v7 = vcombine.low %v368_v60, %v372_v61 }
 0x12c   :  { %2735 = vmatmul.mubr.msk.bf16.vlgmr.msra.gmra.mrb[0].mxu1 %vm289_vm7, %v249_v4  ;;  %v2464_v4 = vcombine.high %v368_v60, %v372_v61 }
 0x12d   :  { %786 = vmatpush1.bf16.msra.mxu1 %v2453_v25  ;;  %v2493_v25 = vcombine.low %v399_v21, %v403_v22  ;;  %817 = vmatprep.mubr.bf16.mxu1 %v3112_v46  ;;  %v408_v21 = vld [vmem:[#allocation2 + $0x188] sm:$0xff] }
 0x12e   :  { %787 = vmatprep.subr.bf16.mxu1 %v2462_v8  ;;  %v2472_v8 = vcombine.high %v376_v5, %v380_v6  ;;  %v412_v22 = vld [vmem:[#allocation2 + $0x1a8] sm:$0xff] }
 0x12f   :  { %v2503_v27 = vcombine.low %v408_v21, %v412_v22 }
 0x131   :  { %788 = vmatpush1.bf16.msra.mxu1 %v2461_v11  ;;  %v2471_v11 = vcombine.low %v376_v5, %v380_v6  ;;  %v2800_v5 = vld [vmem:[#allocation5 + $0x24] ss:$8 sps:$4 sm:$0xff]   ;;  %v2798_v6 = vld [vmem:[#allocation5 + $0x20] ss:$8 sps:$4 sm:$0xff]  }
 0x132   :  { %789 = vmatprep.subr.bf16.mxu1 %v2470_v12  ;;  %v2480_v12 = vcombine.high %v384_v9, %v388_v10 }
 0x135   :  { %790 = vmatpush1.bf16.msra.mxu1 %v2469_v15  ;;  %v2479_v15 = vcombine.low %v384_v9, %v388_v10  ;;  %v2806_v9 = vld [vmem:[#allocation5 + $0x44] ss:$8 sps:$4 sm:$0xff]   ;;  %v2804_v10 = vld [vmem:[#allocation5 + $0x40] ss:$8 sps:$4 sm:$0xff]  }
 0x136   :  { %791 = vmatprep.subr.bf16.mxu1 %v2478_v16  ;;  %v2488_v16 = vcombine.high %v392_v13, %v396_v14 }
 0x139   :  { %792 = vmatpush1.bf16.msra.mxu1 %v2477_v19  ;;  %v2487_v19 = vcombine.low %v392_v13, %v396_v14  ;;  %v2810_v13 = vld [vmem:[#allocation5 + $0x60] ss:$8 sps:$4 sm:$0xff]  }
 0x13a   :  { %793 = vmatprep.subr.bf16.mxu1 %v2486_v20  ;;  %v2496_v20 = vcombine.high %v400_v17, %v404_v18  ;;  %v2816_v14 = vld [vmem:[#allocation5 + $0x100] ss:$8 sps:$4 sm:$0xff]  }
 0x13d   :  { %794 = vmatpush1.bf16.msra.mxu1 %v2485_v23  ;;  %v2495_v23 = vcombine.low %v400_v17, %v404_v18  ;;  %v2822_v17 = vld [vmem:[#allocation5 + $0x110] ss:$8 sps:$4 sm:$0xff]   ;;  %v2821_v18 = vld [vmem:[#allocation5 + $0x84] ss:$8 sps:$4 sm:$0xff]  }
 0x13e   :  { %795 = vmatprep.subr.bf16.mxu1 %v2494_v24  ;;  %v2504_v24 = vcombine.high %v408_v21, %v412_v22  ;;  %v2828_v21 = vld [vmem:[#allocation5 + $0x120] ss:$8 sps:$4 sm:$0xff]   ;;  %v2827_v22 = vld [vmem:[#allocation5 + $0x94] ss:$8 sps:$4 sm:$0xff]  }
 0x141   :  { %796 = vmatpush1.bf16.msra.mxu1 %v2493_v25  ;;  %v416_v25 = vld [vmem:[#allocation2 + $0x1c8] sm:$0xff] }
 0x142   :  { %797 = vmatprep.subr.bf16.mxu1 %v2502_v28  ;;  %v2512_v28 = vcombine.high %v416_v25, %v420_v26 }
 0x145   :  { %798 = vmatpush1.bf16.msra.mxu1 %v2501_v31  ;;  %v2511_v31 = vcombine.low %v416_v25, %v420_v26  ;;  %v2834_v25 = vld [vmem:[#allocation5 + $0x130] ss:$8 sps:$4 sm:$0xff]   ;;  %v2833_v26 = vld [vmem:[#allocation5 + $0xa4] ss:$8 sps:$4 sm:$0xff]  }
 0x146   :  { %799 = vmatprep.subr.bf16.mxu1 %v2510_v36  ;;  %v2468_v36 = vcombine.high %v370_v33, %v374_v34 }
 0x149   :  { %800 = vmatpush1.bf16.msra.mxu1 %v2509_v39  ;;  %v2467_v39 = vcombine.low %v370_v33, %v374_v34  ;;  %v2846_v33 = vld [vmem:[#allocation5 + $0x150] ss:$8 sps:$4 sm:$0xff]   ;;  %v2845_v34 = vld [vmem:[#allocation5 + $0xc4] ss:$8 sps:$4 sm:$0xff]  }
 0x14a   :  { %838 = vmatprep.subr.bf16.mxu1 %v2456_v44  ;;  %v2484_v44 = vcombine.high %v386_v41, %v390_v42 }
 0x1ff   :  { %v2736_v48 = vpop.f32.mrb[0].mxu1 }
 0x200   :  { %v339_v49 = vadd.f32 %v2736_v48, %v2446_v47  ;;  %v330_v50 = vpop.f32.mrb[1].mxu1  ;;  %v2483_v48 = vcombine.low %v386_v41, %v390_v42  ;;  %v2849_v41 = vld [vmem:[#allocation5 + $0xd0] ss:$8 sps:$4 sm:$0xff]   ;;  %v2857_v42 = vld [vmem:[#allocation5 + $0xe4] ss:$8 sps:$4 sm:$0xff]  }
 0x201   :  { %v331_v51 = vadd.f32 %v2446_v47, %v330_v50  ;;  %v2737_v52 = vpop.f32.mrb[2].mxu1  ;;  %v402_v50 = vld [vmem:[#allocation2 + $0x158] sm:$0xff] }
 0x202   :  { %v351_v53 = vmul.f32 0.01, %v339_v49  ;;  %v342_v54 = vadd.f32 %v2737_v52, %v2446_v47  ;;  %v333_v55 = vpop.f32.mrb[3].mxu1  ;;  %vm347_vm8 = vcmp.gt.f32.partialorder %v339_v49, 0.0 }
 0x203   :  { %v349_v56 = vmul.f32 0.01, %v331_v51  ;;  %v334_v57 = vadd.f32 %v2446_v47, %v333_v55  ;;  %vm345_vm9 = vcmp.gt.f32.partialorder %v331_v51, 0.0  ;;  %v398_v47 = vld [vmem:[#allocation2 + $0x138] sm:$0xff] }
 0x204   :  { %vm348_vm10 = vcmp.gt.f32.partialorder %v342_v54, 0.0  ;;  %v352_v58 = vmul.f32 0.01, %v342_v54  ;;  %v355_v62 = vsel %vm347_vm8, %v339_v49, %v351_v53  ;;  %v414_v55 = vld [vmem:[#allocation2 + $0x1b8] sm:$0xff] }
 0x205   :  { %vm346_vm11 = vcmp.gt.f32.partialorder %v334_v57, 0.0  ;;  %v350_v59 = vmul.f32 0.01, %v334_v57  ;;  %v353_v0 = vsel %vm345_vm9, %v331_v51, %v349_v56  ;;  %v406_v51 = vld [vmem:[#allocation2 + $0x178] sm:$0xff] }
 0x206   :  { %v356_v63 = vsel %vm348_vm10, %v342_v54, %v352_v58  ;;  %v2500_v53 = vcombine.high %v402_v50, %v406_v51  ;;  %v410_v54 = vld [vmem:[#allocation2 + $0x198] sm:$0xff]  ;;  %v2499_v56 = vcombine.low %v402_v50, %v406_v51  ;;  %v2872_v51 = vld [vmem:[#allocation5 + $0x1a4] ss:$8 sps:$4 sm:$0xff]  }
 0x207   :  { %v3292_v1 = vpack.c.bf16 %v356_v63, %v355_v62  ;;  %v354_v2 = vsel %vm346_vm11, %v334_v57, %v350_v59  ;;  %v2508_v57 = vcombine.high %v410_v54, %v414_v55  ;;  %v418_v58 = vld [vmem:[#allocation2 + $0x1d8] sm:$0xff]  ;;  %v2507_v60 = vcombine.low %v410_v54, %v414_v55  ;;  %v2794_v63 = vld [vmem:[#allocation5 + $0x4] ss:$8 sps:$4 sm:$0xff]  }
 0x208   :  { %v3294_v3 = vpack.c.bf16 %v354_v2, %v353_v0  ;;  %v422_v59 = vld [vmem:[#allocation2 + $0x1f8] sm:$0xff]  ;;  %v2792_v0 = vld [vmem:[#allocation5] ss:$8 sps:$4 sm:$0xff]   ;;  %v2878_v55 = vld [vmem:[#allocation5 + $0x1c4] ss:$8 sps:$4 sm:$0xff]  }
 0x209   :  { %v2516_v61 = vcombine.high %v418_v58, %v422_v59  ;;  %v2515_v62 = vcombine.low %v418_v58, %v422_v59  ;;  %v2797_v2 = vld [vmem:[#allocation5 + $0x14] ss:$8 sps:$4 sm:$0xff]   ;;  %v2867_v50 = vld [vmem:[#allocation5 + $0x190] ss:$8 sps:$4 sm:$0xff]   ;;  %v2884_v59 = vld [vmem:[#allocation5 + $0x1e4] ss:$8 sps:$4 sm:$0xff]  }
 0x20a   :  { %818 = vmatmul.mubr.bf16.vlgmr.msra.gmra.mrb[4].mxu1 %v3294_v3  ;;  %924 = vmatmul.mubr.bf16.vlgmr.msra.gmra.mrb[4].mxu0 %v3294_v3  ;;  %v2873_v54 = vld [vmem:[#allocation5 + $0x1b0] ss:$8 sps:$4 sm:$0xff]  }
 0x20b   :  { %839 = vmatpush1.bf16.msra.mxu1 %v2455_v45  ;;  %827 = vmatprep.mubr.bf16.mxu1 %v3112_v46  ;;  %v394_v45 = vld [vmem:[#allocation2 + $0x118] sm:$0xff] }
 0x20c   :  { %840 = vmatprep.subr.bf16.mxu1 %v2464_v4  ;;  %933 = vmatprep.mubr.bf16.mxu0 %v3112_v46  ;;  %v2492_v49 = vcombine.high %v394_v45, %v398_v47  ;;  %v2491_v52 = vcombine.low %v394_v45, %v398_v47  ;;  %v2795_v4 = vld [vmem:[#allocation5 + $0x10] ss:$8 sps:$4 sm:$0xff]   ;;  %v2864_v45 = vld [vmem:[#allocation5 + $0x180] ss:$8 sps:$4 sm:$0xff]   ;;  %v2863_v47 = vld [vmem:[#allocation5 + $0xf4] ss:$8 sps:$4 sm:$0xff]  }
 0x20d   :  { %v2879_v58 = vld [vmem:[#allocation5 + $0x1d0] ss:$8 sps:$4 sm:$0xff]  }
 0x20f   :  { %841 = vmatpush1.bf16.msra.mxu1 %v2463_v7  ;;  %v2803_v7 = vld [vmem:[#allocation5 + $0x34] ss:$8 sps:$4 sm:$0xff]  }
 0x210   :  { %842 = vmatprep.subr.bf16.mxu1 %v2472_v8  ;;  %v2801_v8 = vld [vmem:[#allocation5 + $0x30] ss:$8 sps:$4 sm:$0xff]  }
 0x212   :  { %828 = vmatmul.mubr.bf16.gmra.mrb[8].mxu1 %v3292_v1  ;;  %934 = vmatmul.mubr.bf16.gmra.mrb[8].mxu0 %v3292_v1 }
 0x213   :  { %843 = vmatpush1.bf16.msra.mxu1 %v2471_v11  ;;  %870 = vmatprep.mubr.bf16.mxu1 %v3112_v46  ;;  %v2812_v11 = vld [vmem:[#allocation5 + $0x64] ss:$8 sps:$4 sm:$0xff]  }
 0x214   :  { %844 = vmatprep.subr.bf16.mxu1 %v2480_v12  ;;  %v2818_v12 = vld [vmem:[#allocation5 + $0x104] ss:$8 sps:$4 sm:$0xff]  }
 0x215   :  { %2003 = vmatprep.subr.bf16.mxu0 %v2818_v12 }
 0x216   :  { %2004 = vmatpush1.bf16.msra.mxu0 %v2816_v14 }
 0x217   :  { %845 = vmatpush1.bf16.msra.mxu1 %v2479_v15  ;;  %v2815_v15 = vld [vmem:[#allocation5 + $0x74] ss:$8 sps:$4 sm:$0xff]  }
 0x218   :  { %846 = vmatprep.subr.bf16.mxu1 %v2488_v16  ;;  %v2813_v16 = vld [vmem:[#allocation5 + $0x70] ss:$8 sps:$4 sm:$0xff]  }
 0x21b   :  { %847 = vmatpush1.bf16.msra.mxu1 %v2487_v19  ;;  %v2830_v19 = vld [vmem:[#allocation5 + $0x124] ss:$8 sps:$4 sm:$0xff]  }
 0x21c   :  { %848 = vmatprep.subr.bf16.mxu1 %v2496_v20  ;;  %v2819_v20 = vld [vmem:[#allocation5 + $0x80] ss:$8 sps:$4 sm:$0xff]  }
 0x21f   :  { %849 = vmatpush1.bf16.msra.mxu1 %v2495_v23  ;;  %v2836_v23 = vld [vmem:[#allocation5 + $0x134] ss:$8 sps:$4 sm:$0xff]  }
 0x220   :  { %850 = vmatprep.subr.bf16.mxu1 %v2504_v24  ;;  %v2825_v24 = vld [vmem:[#allocation5 + $0x90] ss:$8 sps:$4 sm:$0xff]  }
 0x223   :  { %851 = vmatpush1.bf16.msra.mxu1 %v2503_v27  ;;  %v2842_v27 = vld [vmem:[#allocation5 + $0x144] ss:$8 sps:$4 sm:$0xff]  }
 0x224   :  { %852 = vmatprep.subr.bf16.mxu1 %v2512_v28  ;;  %v2831_v28 = vld [vmem:[#allocation5 + $0xa0] ss:$8 sps:$4 sm:$0xff]  }
 0x227   :  { %853 = vmatpush1.bf16.msra.mxu1 %v2511_v31  ;;  %v2848_v31 = vld [vmem:[#allocation5 + $0x154] ss:$8 sps:$4 sm:$0xff]  }
 0x228   :  { %944 = vmatprep.subr.bf16.mxu1 %v2460_v32  ;;  %v2837_v32 = vld [vmem:[#allocation5 + $0xb0] ss:$8 sps:$4 sm:$0xff]  }
 0x22a   :  { %871 = vmatmul.mubr.bf16.vlgmr.msra.gmra.mrb[12].mxu1 %v3294_v3 }
 0x22b   :  { %945 = vmatpush1.bf16.msra.mxu1 %v2459_v35  ;;  %880 = vmatprep.mubr.bf16.mxu1 %v3112_v46  ;;  %v2854_v35 = vld [vmem:[#allocation5 + $0x164] ss:$8 sps:$4 sm:$0xff]  }
 0x22c   :  { %946 = vmatprep.subr.bf16.mxu1 %v2468_v36  ;;  %v2843_v36 = vld [vmem:[#allocation5 + $0xc0] ss:$8 sps:$4 sm:$0xff]  }
 0x22f   :  { %947 = vmatpush1.bf16.msra.mxu1 %v2467_v39  ;;  %v2858_v39 = vld [vmem:[#allocation5 + $0x170] ss:$8 sps:$4 sm:$0xff]  }
 0x230   :  { %948 = vmatprep.subr.bf16.mxu1 %v2476_v40  ;;  %v2860_v40 = vld [vmem:[#allocation5 + $0x174] ss:$8 sps:$4 sm:$0xff]  }
 0x232   :  { %881 = vmatmul.mubr.bf16.gmra.mrb[16].mxu1 %v3292_v1 }
 0x233   :  { %949 = vmatpush1.bf16.msra.mxu1 %v2475_v43  ;;  %976 = vmatprep.mubr.bf16.mxu1 %v3112_v46  ;;  %v2866_v43 = vld [vmem:[#allocation5 + $0x184] ss:$8 sps:$4 sm:$0xff]  }
 0x234   :  { %950 = vmatprep.subr.bf16.mxu1 %v2484_v44  ;;  %v2855_v44 = vld [vmem:[#allocation5 + $0xe0] ss:$8 sps:$4 sm:$0xff]  }
 0x237   :  { %951 = vmatpush1.bf16.msra.mxu1 %v2483_v48  ;;  %v2869_v48 = vld [vmem:[#allocation5 + $0x194] ss:$8 sps:$4 sm:$0xff]  }
 0x238   :  { %952 = vmatprep.subr.bf16.mxu1 %v2492_v49  ;;  %v2861_v49 = vld [vmem:[#allocation5 + $0xf0] ss:$8 sps:$4 sm:$0xff]  }
 0x23b   :  { %953 = vmatpush1.bf16.msra.mxu1 %v2491_v52  ;;  %v2870_v52 = vld [vmem:[#allocation5 + $0x1a0] ss:$8 sps:$4 sm:$0xff]  }
 0x23c   :  { %954 = vmatprep.subr.bf16.mxu1 %v2500_v53  ;;  %v2875_v53 = vld [vmem:[#allocation5 + $0x1b4] ss:$8 sps:$4 sm:$0xff]  }
 0x23f   :  { %955 = vmatpush1.bf16.msra.mxu1 %v2499_v56  ;;  %v2876_v56 = vld [vmem:[#allocation5 + $0x1c0] ss:$8 sps:$4 sm:$0xff]  }
 0x240   :  { %956 = vmatprep.subr.bf16.mxu1 %v2508_v57  ;;  %v2881_v57 = vld [vmem:[#allocation5 + $0x1d4] ss:$8 sps:$4 sm:$0xff]  }
 0x243   :  { %957 = vmatpush1.bf16.msra.mxu1 %v2507_v60  ;;  %v2882_v60 = vld [vmem:[#allocation5 + $0x1e0] ss:$8 sps:$4 sm:$0xff]  }
 0x244   :  { %958 = vmatprep.subr.bf16.mxu1 %v2516_v61  ;;  %v2885_v61 = vld [vmem:[#allocation5 + $0x1f0] ss:$8 sps:$4 sm:$0xff]  }
 0x247   :  { %959 = vmatpush1.bf16.msra.mxu1 %v2515_v62  ;;  %v2887_v62 = vld [vmem:[#allocation5 + $0x1f4] ss:$8 sps:$4 sm:$0xff]  }
 0x248   :  { %1962 = vmatprep.subr.bf16.mxu1 %v2794_v63  ;;  %v2890_v63 = vld [vmem:[#allocation5 + $0x204] ss:$8 sps:$4 sm:$0xff]  }
 0x24a   :  { %977 = vmatmul.mubr.bf16.vlgmr.msra.gmra.mrb[20].mxu1 %v3294_v3  ;;  %v2809_v3 = vld [vmem:[#allocation5 + $0x54] ss:$8 sps:$4 sm:$0xff]  }
 0x24b   :  { %986 = vmatprep.mubr.bf16.mxu1 %v3112_v46  ;;  %1963 = vmatpush1.bf16.msra.mxu1 %v2792_v0  ;;  %v2807_v46 = vld [vmem:[#allocation5 + $0x50] ss:$8 sps:$4 sm:$0xff]   ;;  %v425_v0 = vlaneseq }
 0x24c   :  { %1964 = vmatprep.subr.bf16.mxu1 %v2797_v2 }
 0x24d   :  { %v3310_v2 = vshrl.u32 %v425_v0, 7 }
 0x24f   :  { %1965 = vmatpush1.bf16.msra.mxu1 %v2795_v4  ;;  %v427_v4 = vsub.s32 0, %v3310_v2 }
 0x250   :  { %1966 = vmatprep.subr.bf16.mxu1 %v2800_v5  ;;  %v443_v5 = vsub.s32 4, %v3310_v2 }
 0x252   :  { %987 = vmatmul.mubr.bf16.gmra.mrb[24].mxu1 %v3292_v1  ;;  %v2824_v1 = vld [vmem:[#allocation5 + $0x114] ss:$8 sps:$4 sm:$0xff]  }
 0x253   :  { %1967 = vmatpush1.bf16.msra.mxu1 %v2798_v6  ;;  %2005 = vmatprep.subr.bf16.mxu0 %v2824_v1  ;;  %v3317_v6 = vld [vmem:[%s3413_s7] sm:$0xff] }
 0x254   :  { %1968 = vmatprep.subr.bf16.mxu1 %v2803_v7  ;;  %2006 = vmatpush1.bf16.msra.mxu0 %v2822_v17  ;;  %v431_v7 = vsub.s32 1, %v3310_v2 }
 0x255   :  { %2007 = vmatprep.subr.bf16.mxu0 %v2830_v19 }
 0x257   :  { %1969 = vmatpush1.bf16.msra.mxu1 %v2801_v8  ;;  %v447_v8 = vsub.s32 5, %v3310_v2 }
 0x258   :  { %1970 = vmatprep.subr.bf16.mxu1 %v2806_v9  ;;  %2008 = vmatpush1.bf16.msra.mxu0 %v2828_v21  ;;  %v428_v9 = vrot.slane %v3317_v6, %v427_v4 }
 0x259   :  { %2009 = vmatprep.subr.bf16.mxu0 %v2836_v23  ;;  %v448_v12 = vrot.slane %v3317_v6, %v447_v8 }
 0x25b   :  { %1971 = vmatpush1.bf16.msra.mxu1 %v2804_v10  ;;  %v444_v10 = vrot.slane %v3317_v6, %v443_v5 }
 0x25c   :  { %1972 = vmatprep.subr.bf16.mxu1 %v2809_v3  ;;  %2010 = vmatpush1.bf16.msra.mxu0 %v2834_v25 }
 0x25d   :  { %2011 = vmatprep.subr.bf16.mxu0 %v2842_v27 }
 0x25f   :  { %1973 = vmatpush1.bf16.msra.mxu1 %v2807_v46 }
 0x260   :  { %1974 = vmatprep.subr.bf16.mxu1 %v2812_v11  ;;  %2012 = vmatpush1.bf16.msra.mxu0 %v2840_v29  ;;  %v432_v11 = vrot.slane %v3317_v6, %v431_v7 }
 0x261   :  { %2013 = vmatprep.subr.bf16.mxu0 %v2848_v31 }
 0x263   :  { %1975 = vmatpush1.bf16.msra.mxu1 %v2810_v13 }
 0x264   :  { %1976 = vmatprep.subr.bf16.mxu1 %v2815_v15  ;;  %2014 = vmatpush1.bf16.msra.mxu0 %v2846_v33 }
 0x265   :  { %2015 = vmatprep.subr.bf16.mxu0 %v2854_v35 }
 0x267   :  { %1977 = vmatpush1.bf16.msra.mxu1 %v2813_v16 }
 0x268   :  { %1978 = vmatprep.subr.bf16.mxu1 %v2821_v18  ;;  %2016 = vmatpush1.bf16.msra.mxu0 %v2852_v37 }
 0x269   :  { %2017 = vmatprep.subr.bf16.mxu0 %v2860_v40 }
 0x26b   :  { %1979 = vmatpush1.bf16.msra.mxu1 %v2819_v20 }
 0x26c   :  { %1980 = vmatprep.subr.bf16.mxu1 %v2827_v22  ;;  %2018 = vmatpush1.bf16.msra.mxu0 %v2858_v39 }
 0x26d   :  { %2019 = vmatprep.subr.bf16.mxu0 %v2866_v43 }
 0x26f   :  { %1981 = vmatpush1.bf16.msra.mxu1 %v2825_v24 }
 0x270   :  { %1982 = vmatprep.subr.bf16.mxu1 %v2833_v26  ;;  %2020 = vmatpush1.bf16.msra.mxu0 %v2864_v45 }
 0x271   :  { %2021 = vmatprep.subr.bf16.mxu0 %v2869_v48 }
 0x273   :  { %1983 = vmatpush1.bf16.msra.mxu1 %v2831_v28 }
 0x274   :  { %1984 = vmatprep.subr.bf16.mxu1 %v2839_v30  ;;  %2022 = vmatpush1.bf16.msra.mxu0 %v2867_v50 }
 0x275   :  { %2023 = vmatprep.subr.bf16.mxu0 %v2872_v51 }
 0x277   :  { %1985 = vmatpush1.bf16.msra.mxu1 %v2837_v32 }
 0x278   :  { %1986 = vmatprep.subr.bf16.mxu1 %v2845_v34  ;;  %2024 = vmatpush1.bf16.msra.mxu0 %v2870_v52 }
 0x279   :  { %2025 = vmatprep.subr.bf16.mxu0 %v2875_v53 }
 0x27b   :  { %1987 = vmatpush1.bf16.msra.mxu1 %v2843_v36 }
 0x27c   :  { %1988 = vmatprep.subr.bf16.mxu1 %v2851_v38  ;;  %2026 = vmatpush1.bf16.msra.mxu0 %v2873_v54 }
 0x27d   :  { %2027 = vmatprep.subr.bf16.mxu0 %v2878_v55 }
 0x27f   :  { %1989 = vmatpush1.bf16.msra.mxu1 %v2849_v41 }
 0x280   :  { %1990 = vmatprep.subr.bf16.mxu1 %v2857_v42  ;;  %2028 = vmatpush1.bf16.msra.mxu0 %v2876_v56 }
 0x281   :  { %2029 = vmatprep.subr.bf16.mxu0 %v2881_v57 }
 0x283   :  { %1991 = vmatpush1.bf16.msra.mxu1 %v2855_v44 }
 0x284   :  { %1992 = vmatprep.subr.bf16.mxu1 %v2863_v47  ;;  %2030 = vmatpush1.bf16.msra.mxu0 %v2879_v58 }
 0x285   :  { %2031 = vmatprep.subr.bf16.mxu0 %v2884_v59 }
 0x287   :  { %1993 = vmatpush1.bf16.msra.mxu1 %v2861_v49 }
 0x288   :  { %2032 = vmatpush1.bf16.msra.mxu0 %v2882_v60 }
 0x289   :  { %2033 = vmatprep.subr.bf16.mxu0 %v2887_v62 }
 0x28c   :  { %2034 = vmatpush1.bf16.msra.mxu0 %v2885_v61 }
 0x28d   :  { %2044 = vmatprep.subr.bf16.mxu0 %v2890_v63 }
 0x2dd   :  { %v819_v3 = vpop.f32.mrb[4].mxu1  ;;  %v925_v46 = vpop.f32.mrb[4].mxu0 }
 0x2de   :  { %v821_v13 = vpop.f32.mrb[5].mxu1  ;;  %v927_v14 = vpop.f32.mrb[5].mxu0  ;;  %v820_v16 = vadd.f32 %v819_v3, %v428_v9  ;;  %v926_v17 = vadd.f32 %v925_v46, %v444_v10 }
 0x2df   :  { %v823_v15 = vpop.f32.mrb[6].mxu1  ;;  %v929_v1 = vpop.f32.mrb[6].mxu0  ;;  %v822_v22 = vadd.f32 %v821_v13, %v432_v11  ;;  %v928_v23 = vadd.f32 %v927_v14, %v448_v12 }
 0x2e0   :  { %v824_v18 = vadd.f32 %v823_v15, %v428_v9  ;;  %v930_v19 = vadd.f32 %v929_v1, %v444_v10  ;;  %v825_v20 = vpop.f32.mrb[7].mxu1  ;;  %v931_v21 = vpop.f32.mrb[7].mxu0 }
 0x2e1   :  { %v826_v24 = vadd.f32 %v825_v20, %v432_v11  ;;  %v932_v25 = vadd.f32 %v931_v21, %v448_v12 }
 0x2e2   :  { %v997_v26 = vmax.f32 %v820_v16, %v824_v18  ;;  %v1025_v27 = vmax.f32 %v926_v17, %v930_v19 }
 0x2e3   :  { %v1004_v28 = vmax.f32 %v822_v22, %v826_v24  ;;  %v1032_v29 = vmax.f32 %v928_v23, %v932_v25 }
 0x2e4   :  { %v998_v30 = vrot.slane %v997_v26, 4  ;;  %v1026_v31 = vrot.slane %v1025_v27, 4 }
 0x2e5   :  { %v1005_v32 = vrot.slane %v1004_v28, 4  ;;  %v1033_v33 = vrot.slane %v1032_v29, 4  ;;  %v829_v34 = vpop.f32.mrb[8].mxu1  ;;  %v935_v35 = vpop.f32.mrb[8].mxu0 }
 0x2e6   :  { %v999_v36 = vmax.f32 %v997_v26, %v998_v30  ;;  %v1027_v37 = vmax.f32 %v1025_v27, %v1026_v31  ;;  %v830_v38 = vadd.f32 %v829_v34, %v428_v9  ;;  %v936_v39 = vadd.f32 %v935_v35, %v444_v10  ;;  %v831_v40 = vpop.f32.mrb[9].mxu1  ;;  %v937_v41 = vpop.f32.mrb[9].mxu0 }
 0x2e7   :  { %v1006_v42 = vmax.f32 %v1004_v28, %v1005_v32  ;;  %v1034_v43 = vmax.f32 %v1032_v29, %v1033_v33  ;;  %v832_v44 = vadd.f32 %v831_v40, %v432_v11  ;;  %v938_v45 = vadd.f32 %v937_v41, %v448_v12  ;;  %v833_v47 = vpop.f32.mrb[10].mxu1  ;;  %v939_v48 = vpop.f32.mrb[10].mxu0 }
 0x2e8   :  { %v1000_v49 = vrot.slane %v999_v36, 2  ;;  %v1028_v50 = vrot.slane %v1027_v37, 2  ;;  %v834_v51 = vadd.f32 %v833_v47, %v428_v9  ;;  %v940_v52 = vadd.f32 %v939_v48, %v444_v10  ;;  %v835_v53 = vpop.f32.mrb[11].mxu1  ;;  %v941_v54 = vpop.f32.mrb[11].mxu0 }
 0x2e9   :  { %v1007_v55 = vrot.slane %v1006_v42, 2  ;;  %v1035_v56 = vrot.slane %v1034_v43, 2  ;;  %v836_v57 = vadd.f32 %v835_v53, %v432_v11  ;;  %v942_v58 = vadd.f32 %v941_v54, %v448_v12 }
 0x2ea   :  { %v1001_v59 = vmax.f32 %v999_v36, %v1000_v49  ;;  %v1029_v60 = vmax.f32 %v1027_v37, %v1028_v50  ;;  %v1053_v61 = vmax.f32 %v830_v38, %v834_v51  ;;  %v1081_v62 = vmax.f32 %v936_v39, %v940_v52 }
 0x2eb   :  { %v1008_v63 = vmax.f32 %v1006_v42, %v1007_v55  ;;  %v1036_v0 = vmax.f32 %v1034_v43, %v1035_v56  ;;  %v1060_v5 = vmax.f32 %v832_v44, %v836_v57  ;;  %v1088_v8 = vmax.f32 %v938_v45, %v942_v58 }
 0x2ec   :  { %v1054_v3 = vrot.slane %v1053_v61, 4  ;;  %v1082_v46 = vrot.slane %v1081_v62, 4  ;;  %v1002_v9 = vrot.slane %v1001_v59, 1  ;;  %v1030_v10 = vrot.slane %v1029_v60, 1 }
 0x2ed   :  { %v1061_v13 = vrot.slane %v1060_v5, 4  ;;  %v1089_v14 = vrot.slane %v1088_v8, 4  ;;  %v1009_v16 = vrot.slane %v1008_v63, 1  ;;  %v1037_v17 = vrot.slane %v1036_v0, 1 }
 0x2ee   :  { %v1055_v15 = vmax.f32 %v1053_v61, %v1054_v3  ;;  %v1083_v1 = vmax.f32 %v1081_v62, %v1082_v46  ;;  %v1003_v22 = vmax.f32 %v1001_v59, %v1002_v9  ;;  %v1031_v23 = vmax.f32 %v1029_v60, %v1030_v10 }
 0x2ef   :  { %v1062_v11 = vmax.f32 %v1060_v5, %v1061_v13  ;;  %v1090_v12 = vmax.f32 %v1088_v8, %v1089_v14  ;;  %v1010_v26 = vmax.f32 %v1008_v63, %v1009_v16  ;;  %v1038_v27 = vmax.f32 %v1036_v0, %v1037_v17 }
 0x2f0   :  { %v1056_v18 = vrot.slane %v1055_v15, 2  ;;  %v1084_v19 = vrot.slane %v1083_v1, 2  ;;  %v1109_v34 = vpack.c.bf16 %v1003_v22, %v1003_v22  ;;  %v1113_v35 = vpack.c.bf16 %v1031_v23, %v1031_v23 }
 0x2f1   :  { %v1063_v20 = vrot.slane %v1062_v11, 2  ;;  %v1091_v21 = vrot.slane %v1090_v12, 2  ;;  %v1110_v38 = vpack.c.bf16 %v1010_v26, %v1010_v26  ;;  %v1114_v39 = vpack.c.bf16 %v1038_v27, %v1038_v27 }
 0x2f2   :  { %v1057_v24 = vmax.f32 %v1055_v15, %v1056_v18  ;;  %v1085_v25 = vmax.f32 %v1083_v1, %v1084_v19  ;;  %v435_v44 = vsub.s32 2, %v3310_v2  ;;  %v439_v48 = vsub.s32 3, %v3310_v2 }
 0x2f3   :  { %v1064_v28 = vmax.f32 %v1062_v11, %v1063_v20  ;;  %v1092_v29 = vmax.f32 %v1090_v12, %v1091_v21  ;;  %v1281_v49 = vunpack.c.l.b16 %v1109_v34  ;;  %v1285_v50 = vunpack.c.l.b16 %v1113_v35 }
 0x2f4   :  { %v1058_v30 = vrot.slane %v1057_v24, 1  ;;  %v1086_v31 = vrot.slane %v1085_v25, 1  ;;  %v1282_v53 = vunpack.c.l.b16 %v1110_v38  ;;  %v1286_v55 = vunpack.c.l.b16 %v1114_v39 }
 0x2f5   :  { %v1065_v32 = vrot.slane %v1064_v28, 1  ;;  %v1093_v33 = vrot.slane %v1092_v29, 1  ;;  %v436_v57 = vrot.slane %v3317_v6, %v435_v44  ;;  %v440_v61 = vrot.slane %v3317_v6, %v439_v48 }
 0x2f6   :  { %v1059_v36 = vmax.f32 %v1057_v24, %v1058_v30  ;;  %v1087_v37 = vmax.f32 %v1085_v25, %v1086_v31 }
 0x2f7   :  { %v1066_v40 = vmax.f32 %v1064_v28, %v1065_v32  ;;  %v1094_v41 = vmax.f32 %v1092_v29, %v1093_v33 }
 0x2f8   :  { %v1117_v42 = vpack.c.bf16 %v1059_v36, %v1059_v36  ;;  %v1121_v43 = vpack.c.bf16 %v1087_v37, %v1087_v37 }
 0x2f9   :  { %v1118_v45 = vpack.c.bf16 %v1066_v40, %v1066_v40  ;;  %v1122_v47 = vpack.c.bf16 %v1094_v41, %v1094_v41 }
 0x2fa   :  { %v1289_v51 = vunpack.c.l.b16 %v1117_v42  ;;  %v1293_v52 = vunpack.c.l.b16 %v1121_v43 }
 0x2fb   :  { %v1290_v54 = vunpack.c.l.b16 %v1118_v45  ;;  %v1294_v56 = vunpack.c.l.b16 %v1122_v47 }
 0x2fc   :  { %v1298_v58 = vsel %vm1297_vm12, %v1289_v51, %v1281_v49  ;;  %v3334_v59 = vsel %vm1297_vm12, %v1293_v52, %v1285_v50  ;;  %v451_v52 = vsub.s32 6, %v3310_v2 }
 0x2fd   :  { %v872_v60 = vpop.f32.mrb[12].mxu1  ;;  %v1299_v62 = vsel %vm1297_vm12, %v1290_v54, %v1282_v53  ;;  %v3339_v63 = vsel %vm1297_vm12, %v1294_v56, %v1286_v55  ;;  %v1306_v3 = vpack.c.b16 %v1298_v58, %v1298_v58  ;;  %v455_v54 = vsub.s32 7, %v3310_v2  ;;  %v3000_v2 = vld [vmem:[%s3418_s12] sm:$0xff]  }
 0x2fe   :  { %v874_v0 = vpop.f32.mrb[13].mxu1  ;;  %v1307_v5 = vpack.c.b16 %v1299_v62, %v1299_v62  ;;  %v873_v46 = vadd.f32 %v872_v60, %v436_v57  ;;  %v452_v60 = vrot.slane %v3317_v6, %v451_v52 }
 0x2ff   :  { %v876_v8 = vpop.f32.mrb[14].mxu1  ;;  %v875_v9 = vadd.f32 %v874_v0, %v440_v61  ;;  %v456_v0 = vrot.slane %v3317_v6, %v455_v54  ;;  %v2891_v6 = vld [vmem:[#allocation5 + $0x210] ss:$8 sps:$4 sm:$0xff]  }
 0x300   :  { %v877_v13 = vadd.f32 %v876_v8, %v436_v57  ;;  %v878_v14 = vpop.f32.mrb[15].mxu1  ;;  %1994 = vmatprep.mubr.bf16.mxu1 %v1307_v5  ;;  %v2903_v54 = vld [vmem:[#allocation5 + $0x250] ss:$8 sps:$4 sm:$0xff]  }
 0x301   :  { %v879_v10 = vadd.f32 %v878_v14, %v440_v61  ;;  %1995 = vmatmul.mubr.bf16.vlgmr.msra.gmra.mrb[28].mxu1 %v1306_v3 }
 0x302   :  { %v1011_v15 = vmax.f32 %v873_v46, %v877_v13  ;;  %v2888_v46 = vld [vmem:[#allocation5 + $0x200] ss:$8 sps:$4 sm:$0xff]  }
 0x303   :  { %v1018_v1 = vmax.f32 %v875_v9, %v879_v10  ;;  %v2893_v9 = vld [vmem:[#allocation5 + $0x214] ss:$8 sps:$4 sm:$0xff]  }
 0x304   :  { %v1012_v16 = vrot.slane %v1011_v15, 4 }
 0x305   :  { %v1019_v17 = vrot.slane %v1018_v1, 4  ;;  %v882_v11 = vpop.f32.mrb[16].mxu1 }
 0x306   :  { %v1013_v12 = vmax.f32 %v1011_v15, %v1012_v16  ;;  %v884_v18 = vpop.f32.mrb[17].mxu1  ;;  %v883_v22 = vadd.f32 %v882_v11, %v436_v57  ;;  %v1311_v16 = vpack.c.b16 %v3339_v63, %v3339_v63  ;;  %v2899_v63 = vld [vmem:[#allocation5 + $0x234] ss:$8 sps:$4 sm:$0xff]  }
 0x307   :  { %v1020_v19 = vmax.f32 %v1018_v1, %v1019_v17  ;;  %v886_v20 = vpop.f32.mrb[18].mxu1  ;;  %v885_v26 = vadd.f32 %v884_v18, %v440_v61 }
 0x308   :  { %v1014_v21 = vrot.slane %v1013_v12, 2  ;;  %v887_v23 = vadd.f32 %v886_v20, %v436_v57  ;;  %v888_v24 = vpop.f32.mrb[19].mxu1 }
 0x309   :  { %v1021_v25 = vrot.slane %v1020_v19, 2  ;;  %v889_v27 = vadd.f32 %v888_v24, %v440_v61 }
 0x30a   :  { %v1015_v28 = vmax.f32 %v1013_v12, %v1014_v21  ;;  %v1067_v29 = vmax.f32 %v883_v22, %v887_v23 }
 0x30b   :  { %v1022_v30 = vmax.f32 %v1020_v19, %v1021_v25  ;;  %v1074_v31 = vmax.f32 %v885_v26, %v889_v27  ;;  %v2896_v19 = vld [vmem:[#allocation5 + $0x224] ss:$8 sps:$4 sm:$0xff]   ;;  %v2894_v25 = vld [vmem:[#allocation5 + $0x220] ss:$8 sps:$4 sm:$0xff]  }
 0x30c   :  { %v1068_v32 = vrot.slane %v1067_v29, 4  ;;  %v1016_v34 = vrot.slane %v1015_v28, 1 }
 0x30d   :  { %v1075_v33 = vrot.slane %v1074_v31, 4  ;;  %v1023_v36 = vrot.slane %v1022_v30, 1 }
 0x30e   :  { %v1069_v35 = vmax.f32 %v1067_v29, %v1068_v32  ;;  %v1017_v40 = vmax.f32 %v1015_v28, %v1016_v34 }
 0x30f   :  { %v1076_v37 = vmax.f32 %v1074_v31, %v1075_v33  ;;  %v1024_v42 = vmax.f32 %v1022_v30, %v1023_v36 }
 0x310   :  { %v1070_v38 = vrot.slane %v1069_v35, 2  ;;  %v1111_v47 = vpack.c.bf16 %v1017_v40, %v1017_v40  ;;  %v2902_v40 = vld [vmem:[#allocation5 + $0x244] ss:$8 sps:$4 sm:$0xff]  }
 0x311   :  { %v1077_v39 = vrot.slane %v1076_v37, 2  ;;  %v1112_v49 = vpack.c.bf16 %v1024_v42, %v1024_v42 }
 0x312   :  { %v1071_v41 = vmax.f32 %v1069_v35, %v1070_v38  ;;  %v1283_v55 = vunpack.c.l.b16 %v1111_v47 }
 0x313   :  { %v1078_v43 = vmax.f32 %v1076_v37, %v1077_v39  ;;  %v1284_v57 = vunpack.c.l.b16 %v1112_v49  ;;  %v2897_v37 = vld [vmem:[#allocation5 + $0x230] ss:$8 sps:$4 sm:$0xff]   ;;  %v2905_v49 = vld [vmem:[#allocation5 + $0x254] ss:$8 sps:$4 sm:$0xff]  }
 0x314   :  { %v1072_v44 = vrot.slane %v1071_v41, 1 }
 0x315   :  { %v1079_v45 = vrot.slane %v1078_v43, 1 }
 0x316   :  { %v1073_v48 = vmax.f32 %v1071_v41, %v1072_v44 }
 0x317   :  { %v1080_v50 = vmax.f32 %v1078_v43, %v1079_v45  ;;  %v2900_v45 = vld [vmem:[#allocation5 + $0x240] ss:$8 sps:$4 sm:$0xff]  }
 0x318   :  { %v1119_v51 = vpack.c.bf16 %v1073_v48, %v1073_v48 }
 0x319   :  { %v1120_v53 = vpack.c.bf16 %v1080_v50, %v1080_v50 }
 0x31a   :  { %v1291_v56 = vunpack.c.l.b16 %v1119_v51 }
 0x31b   :  { %v1292_v58 = vunpack.c.l.b16 %v1120_v53 }
 0x31c   :  { %v1300_v61 = vsel %vm1297_vm12, %v1291_v56, %v1283_v55 }
 0x31d   :  { %v978_v62 = vpop.f32.mrb[20].mxu1  ;;  %v1301_v5 = vsel %vm1297_vm12, %v1292_v58, %v1284_v57  ;;  %v1308_v14 = vpack.c.b16 %v1300_v61, %v1300_v61  ;;  %v2908_v57 = vld [vmem:[#allocation5 + $0x264] ss:$8 sps:$4 sm:$0xff]  }
 0x31e   :  { %v980_v8 = vpop.f32.mrb[21].mxu1  ;;  %v1309_v3 = vpack.c.b16 %v1301_v5, %v1301_v5  ;;  %v979_v10 = vadd.f32 %v978_v62, %v452_v60 }
 0x31f   :  { %v982_v13 = vpop.f32.mrb[22].mxu1  ;;  %v981_v17 = vadd.f32 %v980_v8, %v456_v0 }
 0x320   :  { %v983_v15 = vadd.f32 %v982_v13, %v452_v60  ;;  %v984_v1 = vpop.f32.mrb[23].mxu1  ;;  %2035 = vmatprep.mubr.bf16.mxu0 %v1309_v3  ;;  %v2911_v3 = vld [vmem:[#allocation5 + $0x274] ss:$8 sps:$4 sm:$0xff]  }
 0x321   :  { %v985_v11 = vadd.f32 %v984_v1, %v456_v0  ;;  %2036 = vmatmul.mubr.bf16.vlgmr.msra.gmra.mrb[12].mxu0 %v1308_v14 }
 0x322   :  { %v1039_v12 = vmax.f32 %v979_v10, %v983_v15  ;;  %2045 = vmatpush1.bf16.msra.mxu0 %v2888_v46  ;;  %2076 = vmatprep.mubr.bf16.mxu0 %v1311_v16  ;;  %v2909_v10 = vld [vmem:[#allocation5 + $0x270] ss:$8 sps:$4 sm:$0xff]   ;;  %v2914_v15 = vld [vmem:[#allocation5 + $0x284] ss:$8 sps:$4 sm:$0xff]  }
 0x323   :  { %v1046_v18 = vmax.f32 %v981_v17, %v985_v11  ;;  %2046 = vmatprep.subr.bf16.mxu0 %v2893_v9 }
 0x324   :  { %v1040_v20 = vrot.slane %v1039_v12, 4 }
 0x325   :  { %v1047_v21 = vrot.slane %v1046_v18, 4  ;;  %v988_v22 = vpop.f32.mrb[24].mxu1 }
 0x326   :  { %v1041_v23 = vmax.f32 %v1039_v12, %v1040_v20  ;;  %2047 = vmatpush1.bf16.msra.mxu0 %v2891_v6  ;;  %v990_v24 = vpop.f32.mrb[25].mxu1  ;;  %v989_v29 = vadd.f32 %v988_v22, %v452_v60  ;;  %v2912_v12 = vld [vmem:[#allocation5 + $0x280] ss:$8 sps:$4 sm:$0xff]   ;;  %v2917_v6 = vld [vmem:[#allocation5 + $0x294] ss:$8 sps:$4 sm:$0xff]  }
 0x327   :  { %v1048_v26 = vmax.f32 %v1046_v18, %v1047_v21  ;;  %v992_v27 = vpop.f32.mrb[26].mxu1  ;;  %2048 = vmatprep.subr.bf16.mxu0 %v2896_v19  ;;  %v991_v33 = vadd.f32 %v990_v24, %v456_v0  ;;  %v2915_v18 = vld [vmem:[#allocation5 + $0x290] ss:$8 sps:$4 sm:$0xff]   ;;  %v2920_v19 = vld [vmem:[#allocation5 + $0x2a4] ss:$8 sps:$4 sm:$0xff]  }
 0x328   :  { %v1042_v28 = vrot.slane %v1041_v23, 2  ;;  %v993_v30 = vadd.f32 %v992_v27, %v452_v60  ;;  %v994_v31 = vpop.f32.mrb[27].mxu1  ;;  %v2918_v20 = vld [vmem:[#allocation5 + $0x2a0] ss:$8 sps:$4 sm:$0xff]   ;;  %v2923_v21 = vld [vmem:[#allocation5 + $0x2b4] ss:$8 sps:$4 sm:$0xff]  }
 0x329   :  { %v1049_v32 = vrot.slane %v1048_v26, 2  ;;  %v995_v34 = vadd.f32 %v994_v31, %v456_v0  ;;  %v2906_v0 = vld [vmem:[#allocation5 + $0x260] ss:$8 sps:$4 sm:$0xff]   ;;  %v2921_v22 = vld [vmem:[#allocation5 + $0x2b0] ss:$8 sps:$4 sm:$0xff]  }
 0x32a   :  { %v1043_v35 = vmax.f32 %v1041_v23, %v1042_v28  ;;  %v1095_v36 = vmax.f32 %v989_v29, %v993_v30  ;;  %2049 = vmatpush1.bf16.msra.mxu0 %v2894_v25  ;;  %v2926_v23 = vld [vmem:[#allocation5 + $0x2c4] ss:$8 sps:$4 sm:$0xff]   ;;  %v2924_v24 = vld [vmem:[#allocation5 + $0x2c0] ss:$8 sps:$4 sm:$0xff]   ;;  %v2929_v25 = vld [vmem:[#allocation5 + $0x2d4] ss:$8 sps:$4 sm:$0xff]  }
 0x32b   :  { %v1050_v38 = vmax.f32 %v1048_v26, %v1049_v32  ;;  %v1102_v39 = vmax.f32 %v991_v33, %v995_v34  ;;  %2050 = vmatprep.subr.bf16.mxu0 %v2899_v63  ;;  %v2927_v26 = vld [vmem:[#allocation5 + $0x2d0] ss:$8 sps:$4 sm:$0xff]   ;;  %v2932_v27 = vld [vmem:[#allocation5 + $0x2e4] ss:$8 sps:$4 sm:$0xff]   ;;  %v2930_v63 = vld [vmem:[#allocation5 + $0x2e0] ss:$8 sps:$4 sm:$0xff]  }
 0x32c   :  { %v1096_v41 = vrot.slane %v1095_v36, 4  ;;  %v1044_v43 = vrot.slane %v1043_v35, 1  ;;  %v2935_v28 = vld [vmem:[#allocation5 + $0x2f4] ss:$8 sps:$4 sm:$0xff]   ;;  %v2984_v29 = vld [vmem:[#allocation7 + $0x40] sm:$0xff]   ;;  %v2986_v31 = vld [vmem:[#allocation7 + $0x48] sm:$0xff]  }
 0x32d   :  { %v1103_v42 = vrot.slane %v1102_v39, 4  ;;  %v1051_v47 = vrot.slane %v1050_v38, 1  ;;  %v2985_v30 = vld [vmem:[#allocation7] sm:$0xff]   ;;  %2683 = vmatprep.subr.bf16.mxu1 %v2984_v29  ;;  %v2933_v32 = vld [vmem:[#allocation5 + $0x2f0] ss:$8 sps:$4 sm:$0xff]   ;;  %v2987_v33 = vld [vmem:[#allocation7 + $0x8] sm:$0xff]  }
 0x32e   :  { %v1097_v44 = vmax.f32 %v1095_v36, %v1096_v41  ;;  %2051 = vmatpush1.bf16.msra.mxu0 %v2897_v37  ;;  %v1045_v52 = vmax.f32 %v1043_v35, %v1044_v43  ;;  %2684 = vmatpush3.bf16.msra.mxu1 %v2985_v30  ;;  %v2938_v34 = vld [vmem:[#allocation5 + $0x304] ss:$8 sps:$4 sm:$0xff]   ;;  %v2988_v35 = vld [vmem:[#allocation7 + $0x50] sm:$0xff]   ;;  %v2936_v36 = vld [vmem:[#allocation5 + $0x300] ss:$8 sps:$4 sm:$0xff]   ;;  %v1310_v37 = vpack.c.b16 %v3334_v59, %v3334_v59 }
 0x32f   :  { %v1104_v48 = vmax.f32 %v1102_v39, %v1103_v42  ;;  %2052 = vmatprep.subr.bf16.mxu0 %v2902_v40  ;;  %v1052_v55 = vmax.f32 %v1050_v38, %v1051_v47  ;;  %2685 = vmatprep.subr.bf16.mxu1 %v2986_v31  ;;  %v2941_v38 = vld [vmem:[#allocation5 + $0x314] ss:$8 sps:$4 sm:$0xff]   ;;  %v2939_v42 = vld [vmem:[#allocation5 + $0x310] ss:$8 sps:$4 sm:$0xff]   ;;  %v2944_v43 = vld [vmem:[#allocation5 + $0x324] ss:$8 sps:$4 sm:$0xff]  }
 0x330   :  { %v1098_v50 = vrot.slane %v1097_v44, 2  ;;  %v1115_v61 = vpack.c.bf16 %v1045_v52, %v1045_v52  ;;  %v2989_v39 = vld [vmem:[#allocation7 + $0x10] sm:$0xff]   ;;  %v2990_v41 = vld [vmem:[#allocation7 + $0x58] sm:$0xff]   ;;  %v2942_v47 = vld [vmem:[#allocation5 + $0x320] ss:$8 sps:$4 sm:$0xff]  }
 0x331   :  { %v1105_v51 = vrot.slane %v1104_v48, 2  ;;  %v1116_v5 = vpack.c.bf16 %v1052_v55, %v1052_v55  ;;  %v2947_v59 = vld [vmem:[#allocation5 + $0x334] ss:$8 sps:$4 sm:$0xff]   ;;  %v2995_v52 = vld [vmem:[#allocation7 + $0x28] sm:$0xff]   ;;  %v2951_v55 = vld [vmem:[#allocation5 + $0x350] ss:$8 sps:$4 sm:$0xff]  }
 0x332   :  { %v1099_v53 = vmax.f32 %v1097_v44, %v1098_v50  ;;  %2053 = vmatpush1.bf16.msra.mxu0 %v2900_v45  ;;  %v1287_v14 = vunpack.c.l.b16 %v1115_v61  ;;  %2686 = vmatpush3.bf16.msra.mxu1 %v2987_v33  ;;  %v2991_v44 = vld [vmem:[#allocation7 + $0x18] sm:$0xff]   ;;  %v2992_v45 = vld [vmem:[#allocation7 + $0x60] sm:$0xff]  }
 0x333   :  { %v1106_v56 = vmax.f32 %v1104_v48, %v1105_v51  ;;  %2054 = vmatprep.subr.bf16.mxu0 %v2905_v49  ;;  %v1288_v1 = vunpack.c.l.b16 %v1116_v5  ;;  %2687 = vmatprep.subr.bf16.mxu1 %v2988_v35  ;;  %v2993_v48 = vld [vmem:[#allocation7 + $0x20] sm:$0xff]   ;;  %v2994_v49 = vld [vmem:[#allocation7 + $0x68] sm:$0xff]   ;;  %v2945_v50 = vld [vmem:[#allocation5 + $0x330] ss:$8 sps:$4 sm:$0xff]  }
 0x334   :  { %v1100_v58 = vrot.slane %v1099_v53, 1  ;;  %v2950_v51 = vld [vmem:[#allocation5 + $0x344] ss:$8 sps:$4 sm:$0xff]   ;;  %v2963_v5 = vld [vmem:[#allocation5 + $0x390] ss:$8 sps:$4 sm:$0xff]  }
 0x335   :  { %v1107_v60 = vrot.slane %v1106_v56, 1  ;;  %v2962_v61 = vld [vmem:[#allocation5 + $0x384] ss:$8 sps:$4 sm:$0xff]  }
 0x336   :  { %v1101_v62 = vmax.f32 %v1099_v53, %v1100_v58  ;;  %2055 = vmatpush1.bf16.msra.mxu0 %v2903_v54  ;;  %2688 = vmatpush3.bf16.msra.mxu1 %v2989_v39  ;;  %v2948_v53 = vld [vmem:[#allocation5 + $0x340] ss:$8 sps:$4 sm:$0xff]   ;;  %v2953_v54 = vld [vmem:[#allocation5 + $0x354] ss:$8 sps:$4 sm:$0xff]  }
 0x337   :  { %v1108_v8 = vmax.f32 %v1106_v56, %v1107_v60  ;;  %2056 = vmatprep.subr.bf16.mxu0 %v2908_v57  ;;  %2689 = vmatprep.subr.bf16.mxu1 %v2990_v41  ;;  %v2956_v56 = vld [vmem:[#allocation5 + $0x364] ss:$8 sps:$4 sm:$0xff]   ;;  %v2954_v57 = vld [vmem:[#allocation5 + $0x360] ss:$8 sps:$4 sm:$0xff]   ;;  %v2959_v58 = vld [vmem:[#allocation5 + $0x374] ss:$8 sps:$4 sm:$0xff]  }
 0x338   :  { %v1123_v46 = vpack.c.bf16 %v1101_v62, %v1101_v62  ;;  %v2957_v60 = vld [vmem:[#allocation5 + $0x370] ss:$8 sps:$4 sm:$0xff]   ;;  %v2960_v62 = vld [vmem:[#allocation5 + $0x380] ss:$8 sps:$4 sm:$0xff]  }
 0x339   :  { %v1124_v13 = vpack.c.bf16 %v1108_v8, %v1108_v8  ;;  %v2968_v8 = vld [vmem:[#allocation5 + $0x3a4] ss:$8 sps:$4 sm:$0xff]   ;;  %v3002_v41 = vld [vmem:[%s3418_s12 + $0x10] sm:$0xff]  }
 0x33a   :  { %v1295_v9 = vunpack.c.l.b16 %v1123_v46  ;;  %2057 = vmatpush1.bf16.msra.mxu0 %v2906_v0  ;;  %2690 = vmatpush3.bf16.msra.mxu1 %v2991_v44  ;;  %v2965_v0 = vld [vmem:[#allocation5 + $0x394] ss:$8 sps:$4 sm:$0xff]   ;;  %v3005_v44 = vld [vmem:[%s3418_s12 + $0x28] sm:$0xff]  }
 0x33b   :  { %2058 = vmatprep.subr.bf16.mxu0 %v2911_v3  ;;  %v1296_v16 = vunpack.c.l.b16 %v1124_v13  ;;  %2691 = vmatprep.subr.bf16.mxu1 %v2992_v45  ;;  %v2966_v3 = vld [vmem:[#allocation5 + $0x3a0] ss:$8 sps:$4 sm:$0xff]   ;;  %v2971_v46 = vld [vmem:[#allocation5 + $0x3b4] ss:$8 sps:$4 sm:$0xff]   ;;  %v2969_v13 = vld [vmem:[#allocation5 + $0x3b0] ss:$8 sps:$4 sm:$0xff]  }
 0x33c   :  { %v3350_v17 = vsel %vm1297_vm12, %v1295_v9, %v1287_v14  ;;  %v2974_v14 = vld [vmem:[#allocation5 + $0x3c4] ss:$8 sps:$4 sm:$0xff]   ;;  %v2972_v9 = vld [vmem:[#allocation5 + $0x3c0] ss:$8 sps:$4 sm:$0xff]   ;;  %v3006_v45 = vld [vmem:[%s3418_s12 + $0x30] sm:$0xff]  }
 0x33d   :  { %v1305_v11 = vsel %vm1297_vm12, %v1296_v16, %v1288_v1  ;;  %v2980_v1 = vld [vmem:[#allocation5 + $0x3e4] ss:$8 sps:$4 sm:$0xff]   ;;  %v2978_v16 = vld [vmem:[#allocation5 + $0x3e0] ss:$8 sps:$4 sm:$0xff]  }
 0x33e   :  { %2059 = vmatpush1.bf16.msra.mxu0 %v2909_v10  ;;  %v1313_v40 = vpack.c.b16 %v1305_v11, %v1305_v11  ;;  %2692 = vmatpush3.bf16.msra.mxu1 %v2993_v48  ;;  %v2977_v10 = vld [vmem:[#allocation5 + $0x3d4] ss:$8 sps:$4 sm:$0xff]   ;;  %v2645_v48 = vld [vmem:[%s3417_s11] ss:$0 sm:$0xff]  ;;  %s3074_s11 = scalar_lea.vmem %s2432_s4, 32 }
 0x33f   :  { %2060 = vmatprep.subr.bf16.mxu0 %v2914_v15  ;;  %2693 = vmatprep.subr.bf16.mxu1 %v2994_v49  ;;  %v2975_v15 = vld [vmem:[#allocation5 + $0x3d0] ss:$8 sps:$4 sm:$0xff]   ;;  %v2983_v11 = vld [vmem:[#allocation5 + $0x3f4] ss:$8 sps:$4 sm:$0xff]   ;;  %p3075_p10 = scmp.ne.s32.totalorder %s2432_s4, %s3074_s11  ;;  %p3080_p12 = scmp.lt.s32.totalorder %s3074_s11, %s3074_s11 }
 0x341   :  { %p3081_p13 = por %p3080_p12, %p3079_p11 }
 0x342   :  { %2061 = vmatpush1.bf16.msra.mxu0 %v2912_v12  ;;  %2694 = vmatpush3.bf16.msra.mxu1 %v2995_v52  ;;  %v2981_v12 = vld [vmem:[#allocation5 + $0x3f0] ss:$8 sps:$4 sm:$0xff]  }
 0x343   :  { %2062 = vmatprep.subr.bf16.mxu0 %v2917_v6  ;;  %v1312_v6 = vpack.c.b16 %v3350_v17, %v3350_v17  ;;  %p3082_p0 = pnand %p3081_p13, %p3075_p10 }
 0x346   :  { %2063 = vmatpush1.bf16.msra.mxu0 %v2915_v18 }
 0x347   :  { %2064 = vmatprep.subr.bf16.mxu0 %v2920_v19 }
 0x34a   :  { %2065 = vmatpush1.bf16.msra.mxu0 %v2918_v20 }
 0x34b   :  { %2066 = vmatprep.subr.bf16.mxu0 %v2923_v21 }
 0x34e   :  { %2067 = vmatpush1.bf16.msra.mxu0 %v2921_v22  ;;  %v2996_v22 = vld [vmem:[#allocation7 + $0x70] sm:$0xff]  }
 0x34f   :  { %2068 = vmatprep.subr.bf16.mxu0 %v2926_v23  ;;  %v2997_v23 = vld [vmem:[#allocation7 + $0x30] sm:$0xff]   ;;  %2695 = vmatprep.subr.bf16.mxu1 %v2996_v22 }
 0x350   :  { %2696 = vmatpush3.bf16.msra.mxu1 %v2997_v23 }
 0x352   :  { %2069 = vmatpush1.bf16.msra.mxu0 %v2924_v24  ;;  %v2998_v24 = vld [vmem:[#allocation7 + $0x78] sm:$0xff]  }
 0x353   :  { %2070 = vmatprep.subr.bf16.mxu0 %v2929_v25  ;;  %v2999_v25 = vld [vmem:[#allocation7 + $0x38] sm:$0xff]   ;;  %2697 = vmatprep.subr.bf16.mxu1 %v2998_v24 }
 0x354   :  { %2698 = vmatpush3.bf16.msra.mxu1 %v2999_v25 }
 0x356   :  { %2071 = vmatpush1.bf16.msra.mxu0 %v2927_v26  ;;  %v3113_v26 = vmov 0.0  }
 0x357   :  { %2072 = vmatprep.subr.bf16.mxu0 %v2932_v27  ;;  %2738 = vmatprep.subr.bf16.mxu1 %v3113_v26  ;;  %v1253_v27 = vld [vmem:[%s3415_s9] sm:$0x3] }
 0x358   :  { %v1258_v17 = vrot.slane %v1253_v27, %v427_v4 }
 0x35a   :  { %2073 = vmatpush1.bf16.msra.mxu0 %v2930_v63  ;;  %v1262_v63 = vrot.slane %v1253_v27, %v431_v7  ;;  %v3001_v7 = vld [vmem:[%s3418_s12 + $0x8] sm:$0xff]  }
 0x35b   :  { %2074 = vmatprep.subr.bf16.mxu0 %v2935_v28 }
 0x35e   :  { %2075 = vmatpush1.bf16.msra.mxu0 %v2933_v32 }
 0x35f   :  { %2085 = vmatprep.subr.bf16.mxu0 %v2938_v34 }
 0x361   :  { %2077 = vmatmul.mubr.bf16.vlgmr.msra.gmra.mrb[12].mxu0 %v1310_v37 }
 0x362   :  { %2086 = vmatpush1.bf16.msra.mxu0 %v2936_v36  ;;  %2117 = vmatprep.mubr.bf16.mxu0 %v1313_v40 }
 0x363   :  { %2087 = vmatprep.subr.bf16.mxu0 %v2941_v38 }
 0x366   :  { %2088 = vmatpush1.bf16.msra.mxu0 %v2939_v42  ;;  %v3003_v42 = vld [vmem:[%s3418_s12 + $0x18] sm:$0xff]  }
 0x367   :  { %2089 = vmatprep.subr.bf16.mxu0 %v2944_v43  ;;  %v3004_v43 = vld [vmem:[%s3418_s12 + $0x20] sm:$0xff]  }
 0x36a   :  { %2090 = vmatpush1.bf16.msra.mxu0 %v2942_v47  ;;  %v3007_v47 = vld [vmem:[%s3418_s12 + $0x38] sm:$0xff]  }
 0x36b   :  { %2091 = vmatprep.subr.bf16.mxu0 %v2947_v59 }
 0x36e   :  { %2092 = vmatpush1.bf16.msra.mxu0 %v2945_v50 }
 0x36f   :  { %2093 = vmatprep.subr.bf16.mxu0 %v2950_v51 }
 0x372   :  { %2094 = vmatpush1.bf16.msra.mxu0 %v2948_v53 }
 0x373   :  { %2095 = vmatprep.subr.bf16.mxu0 %v2953_v54 }
 0x376   :  { %2096 = vmatpush1.bf16.msra.mxu0 %v2951_v55 }
 0x377   :  { %2097 = vmatprep.subr.bf16.mxu0 %v2956_v56 }
 0x37a   :  { %2098 = vmatpush1.bf16.msra.mxu0 %v2954_v57  ;;  %v2662_v57 = vld [vmem:[%s3419_s13] ss:$0 sm:$0xff] }
 0x37b   :  { %2099 = vmatprep.subr.bf16.mxu0 %v2959_v58 }
 0x37e   :  { %2100 = vmatpush1.bf16.msra.mxu0 %v2957_v60 }
 0x37f   :  { %2101 = vmatprep.subr.bf16.mxu0 %v2962_v61 }
 0x382   :  { %2102 = vmatpush1.bf16.msra.mxu0 %v2960_v62 }
 0x383   :  { %2103 = vmatprep.subr.bf16.mxu0 %v2965_v0 }
 0x386   :  { %2104 = vmatpush1.bf16.msra.mxu0 %v2963_v5 }
 0x387   :  { %2105 = vmatprep.subr.bf16.mxu0 %v2968_v8 }
 0x38a   :  { %2106 = vmatpush1.bf16.msra.mxu0 %v2966_v3 }
 0x38b   :  { %2107 = vmatprep.subr.bf16.mxu0 %v2971_v46 }
 0x38e   :  { %2108 = vmatpush1.bf16.msra.mxu0 %v2969_v13 }
 0x38f   :  { %2109 = vmatprep.subr.bf16.mxu0 %v2974_v14 }
 0x392   :  { %2110 = vmatpush1.bf16.msra.mxu0 %v2972_v9 }
 0x393   :  { %2111 = vmatprep.subr.bf16.mxu0 %v2977_v10 }
 0x396   :  { %2112 = vmatpush1.bf16.msra.mxu0 %v2975_v15 }
 0x397   :  { %2113 = vmatprep.subr.bf16.mxu0 %v2980_v1 }
 0x39a   :  { %2114 = vmatpush1.bf16.msra.mxu0 %v2978_v16 }
 0x39b   :  { %2115 = vmatprep.subr.bf16.mxu0 %v2983_v11 }
 0x39e   :  { %2116 = vmatpush1.bf16.msra.mxu0 %v2981_v12 }
 0x3a1   :  { %2118 = vmatmul.mubr.bf16.vlgmr.msra.gmra.mrb[12].mxu0 %v1312_v6 }
 0x3d4   :  { %v1996_v18 = vpop.f32.mrb[28].mxu1 }
 0x3d5   :  { %v1998_v19 = vpop.f32.mrb[29].mxu1  ;;  %v1997_v28 = vadd.f32 %v1996_v18, %v1258_v17 }
 0x3d6   :  { %v2000_v20 = vpop.f32.mrb[30].mxu1  ;;  %v1999_v29 = vadd.f32 %v1998_v19, %v1262_v63 }
 0x3d7   :  { %v2001_v21 = vpop.f32.mrb[31].mxu1 }
 0x474   :  { %v2119_v30 = vpop.f32.mrb[12].mxu0 }
 0x475   :  { %v2759_v31 = vadd.f32 %v2119_v30, %v1997_v28  ;;  %v2121_v32 = vpop.f32.mrb[13].mxu0 }
 0x476   :  { %v2761_v33 = vadd.f32 %v2121_v32, %v1999_v29  ;;  %v2123_v34 = vpop.f32.mrb[14].mxu0 }
 0x477   :  { %vm2126_vm13 = vcmp.gt.f32.partialorder %v2759_v31, 0.0  ;;  %v2128_v35 = vmul.f32 0.01, %v2759_v31  ;;  %v2124_v36 = vpop.f32.mrb[15].mxu0 }
 0x478   :  { %vm2127_vm14 = vcmp.gt.f32.partialorder %v2761_v33, 0.0  ;;  %v2129_v37 = vmul.f32 0.01, %v2761_v33 }
 0x479   :  { %v2130_v38 = vsel %vm2126_vm13, %v2759_v31, %v2128_v35 }
 0x47a   :  { %v2131_v39 = vsel %vm2127_vm14, %v2761_v33, %v2129_v37  ;;  %v2132_v4 = vpack.c.bf16 %v2130_v38, %v2130_v38 }
 0x47b   :  { %v2133_v40 = vpack.c.bf16 %v2131_v39, %v2131_v39 }
 0x47d   :  { %2301 = vmatprep.mubr.bf16.mxu1 %v2133_v40 }
 0x47e   :  { %2302 = vmatmul.mubr.bf16.vlgmr.msra.gmra.mrb[32].mxu1 %v2132_v4 }
 0x47f   :  { %2739 = vmatpush3.bf16.msra.mxu1 %v3000_v2  ;;  %2754 = vmatprep.mubr.msk.bf16.mxu1 %vm3114_vm15, %v3113_v26 }
 0x480   :  { %2740 = vmatprep.subr.bf16.mxu1 %v3113_v26 }
 0x483   :  { %2741 = vmatpush3.bf16.msra.mxu1 %v3001_v7 }
 0x484   :  { %2742 = vmatprep.subr.bf16.mxu1 %v3113_v26 }
 0x487   :  { %2743 = vmatpush3.bf16.msra.mxu1 %v3002_v41 }
 0x488   :  { %2744 = vmatprep.subr.bf16.mxu1 %v3113_v26 }
 0x48b   :  { %2745 = vmatpush3.bf16.msra.mxu1 %v3003_v42 }
 0x48c   :  { %2746 = vmatprep.subr.bf16.mxu1 %v3113_v26 }
 0x48f   :  { %2747 = vmatpush3.bf16.msra.mxu1 %v3004_v43 }
 0x490   :  { %2748 = vmatprep.subr.bf16.mxu1 %v3113_v26 }
 0x493   :  { %2749 = vmatpush3.bf16.msra.mxu1 %v3005_v44 }
 0x494   :  { %2750 = vmatprep.subr.bf16.mxu1 %v3113_v26 }
 0x497   :  { %2751 = vmatpush3.bf16.msra.mxu1 %v3006_v45 }
 0x498   :  { %2752 = vmatprep.subr.bf16.mxu1 %v3113_v26 }
 0x49b   :  { %2753 = vmatpush3.bf16.msra.mxu1 %v3007_v47 }
 0x551   :  { %v2699_v59 = vpop.f32.mrb[32].mxu1 }
 0x552   :  { %v2700_v49 = vpop.f32.mrb[33].mxu1 }
 0x553   :  { %v2701_v50 = vadd.f32 %v2700_v49, %v2699_v59  ;;  %v2702_v51 = vpop.f32.mrb[34].mxu1 }
 0x554   :  { %v2703_v52 = vpop.f32.mrb[35].mxu1 }
 0x555   :  { %v2304_v53 = vadd.f32 %v2701_v50, %v2645_v48 }
 0x557   :  { %vm2309_vm0 = vcmp.gt.f32.partialorder %v2304_v53, 0.0  ;;  %v2310_v54 = vmul.f32 0.01, %v2304_v53 }
 0x559   :  { %v2311_v55 = vsel %vm2309_vm0, %v2304_v53, %v2310_v54 }
 0x55a   :  { %v2312_v56 = vpack.c.bf16 %v2311_v55, %v2311_v55 }
 0x55c   :  { %2755 = vmatmul.mubr.bf16.vlgmr.msra.gmra.mrb[36].mxu1 %v2312_v56 }
 0x62f   :  { %v2418_v58 = vpop.f32.mrb[36].mxu1 }
 0x630   :  { %v2419_v60 = vadd.f32 %v2662_v57, %v2418_v58  ;;  %v2756_v61 = vpop.f32.mrb[37].mxu1 }
 0x631   :  { %v2421_v62 = vpop.f32.mrb[38].mxu1 }
 0x632   :  { %2424 = vst [vmem:[#allocation8] sm:$0x3] %v2419_v60  ;;  %v2757_v0 = vpop.f32.mrb[39].mxu1 }
 0x633   :  { %3085 = shalt.err (!%p3082_p0)
}
 0x634   :  { %s3086_s13 = scalar_lea.hbm %s3420_s14, 32 }
 0x635   :  { %p3087_p1 = scmp.ne.s32.totalorder %s3420_s14, %s3086_s13  ;;  %p3090_p2 = scmp.lt.u32.totalorder %s3086_s13, %s3420_s14 }
 0x637   :  { %p3092_p3 = pnand %p3090_p2, %p3087_p1 }
 0x639   :  { %3095 = shalt.err (!%p3092_p3)
}
 0x63a   :  { %2434 = dma.vmem_to_hbm [thread:$0]  %s2432_s4, 32, %s3420_s14, [#allocation4]  }
 0x63b   :  { %3100 = dma.done.wait [#allocation4], 32  }
 0x63c   :  { %3101 = vsyncadd [#allocation4], 4294967264 }
 0x63d   :  { %2438 = vsyncpa [#allocation3], 1 }
 0x63e   :  { %2439 = vsyncpa [#allocation6], 1 }
 0x63f   :  { %2440 = vsyncpa [#allocation4], 1 }

</bundles_post_ra>
